<compile_context>
chip_gen: v7x
topology: tpu7x:2x2x1
jax: 0.10.0
libtpu: 0.0.40
codegen_flags: <defaults>
</compile_context>

<pallas_src>
import math

import jax
import jax.numpy as jnp
from jax import lax
from jax.experimental import pallas as pl
from jax.experimental.pallas import tpu as pltpu

F32 = jnp.float32
NEG_SLOPE = 0.01      # nn.LeakyReLU default
LN_EPS = 1e-5         # torch_geometric.nn.LayerNorm default eps
GEN_EPS = 1e-7        # GENConv default eps
NEG_INF = -1e30       # finite fill so 0 * NEG_INF stays finite


def _vmem_limit_bytes():
    # Generation-aware scoped-VMEM budget: ~75% of physical, capped at 100 MiB
    # (v5e/v6e: 128 MiB physical -> 96 MiB; v7x: 64 MiB -> 48 MiB). Falls back to a
    # conservative 32 MiB when no TPU is attached (e.g. interpret mode on CPU).
    try:
        cap = int(pltpu.get_tpu_info().vmem_capacity_bytes)
        return max(32 << 20, min((cap * 3) // 4, 100 << 20))
    except Exception:
        return 32 << 20


VMEM_LIMIT = _vmem_limit_bytes()


def _leaky(x):
    return jnp.where(x >= 0, x, NEG_SLOPE * x)


def _dot(a, b):
    return jnp.dot(a, b, preferred_element_type=F32)


def _dotT(a, b):
    # Contraction over axis 0 of BOTH operands: (E, M) x (E, K) -> (M, K).
    # Scatter-add expressed as a matmul so no transposed one-hot copy lives in VMEM.
    # TODO(synk): verify Mosaic lowers this without an XLU transpose at large E; if it
    #             does, derive the transpose once into VMEM scratch instead.
    return lax.dot_general(a, b, (((0,), (0,)), ((), ())), preferred_element_type=F32)


# ----------------------------------------------------------------------------
# Pallas kernels
# ----------------------------------------------------------------------------
def _make_chain_kernel(n_layers):
    """Fused Linear(+LeakyReLU) chain: an entire `mlp(...)` in a single kernel."""
    def kernel(*refs):
        x_ref, o_ref = refs[0], refs[-1]
        w_refs = refs[1:-1]
        h = x_ref[...]
        for i in range(n_layers):
            h = _dot(h, w_refs[2 * i][...]) + w_refs[2 * i + 1][...]
            if i < n_layers - 1:
                h = _leaky(h)
        o_ref[...] = h
    return kernel


def _pool_kernel(node_ref, oht_ref, invc_ref, o_ref):
    """global_mean_pool over real nodes (per-graph mean via one-hot matmul)."""
    o_ref[...] = _dot(oht_ref[...], node_ref[...]) * invc_ref[...]


def _pool_heads_kernel(node_ref, oht_ref, invc_ref, vnode_ref, w_ref, b_ref, o_ref):
    """global_mean_pool fused with the graph-level heads (stop & reward logits):
    the (G, 2C) graph embedding never round-trips through HBM."""
    pooled = _dot(oht_ref[...], node_ref[...]) * invc_ref[...]       # (G, C)
    graph_emb = jnp.concatenate([pooled, vnode_ref[...]], axis=1)    # (G, 2C)
    o_ref[...] = _dot(graph_emb, w_ref[...]) + b_ref[...]


def _make_layer_kernel(num_heads, num_emb):
    """One GraphTransformer layer (ln_type='pre'); called once per grid step (layer)."""
    H, C = num_heads, num_emb
    HC = H * C
    inv_sqrt_d = 1.0 / math.sqrt(C)

    def kernel(o_init_ref, e_ref, oh_src_ref, oh_dst_ref, oh_b_ref, inv_ng_ref, c_ref,
               gen_w_ref, gen_b_ref, wqkvs_ref, bqkvs_ref, wedge_ref,
               wlin_ref, blin_ref, wff1_ref, bff1_ref, wff2_ref, bff2_ref,
               wcs_ref, bcs_ref, o_ref):
        # Residual stream is a VMEM-resident output block across the layer grid axis;
        # initialize it from the embedding output at the first layer only.
        @pl.when(pl.program_id(0) == 0)
        def _():
            o_ref[...] = o_init_ref[...]

        o = o_ref[...]                    # (N, C) residual stream
        e = e_ref[...]                    # (E, C) augmented edge attrs
        oh_src = oh_src_ref[...]          # (E, N) one-hot of source node
        oh_dst = oh_dst_ref[...]          # (E, N) one-hot of destination node
        oh_b = oh_b_ref[...]              # (N, G) one-hot of graph id
        inv_ng = inv_ng_ref[...]          # (G, 1) = 1 / (nodes_in_graph * C)
        c = c_ref[...]                    # (G, C)

        def graph_ln(x):
            # torch_geometric LayerNorm(mode='graph', affine=False): per-graph
            # mean/var over all node features; reductions done at graph granularity.
            gsum = _dotT(oh_b, x)                                     # (G, C)
            mean_g = jnp.sum(gsum, axis=1, keepdims=True) * inv_ng    # (G, 1)
            xc = x - _dot(oh_b, mean_g)                               # (N, C)
            gsq = _dotT(oh_b, xc * xc)                                # (G, C)
            var_g = jnp.sum(gsq, axis=1, keepdims=True) * inv_ng      # (G, 1)
            return xc * lax.rsqrt(_dot(oh_b, var_g) + LN_EPS)

        # --- FiLM conditioning evaluated at G rows (lane-dense 2C), gathered to nodes
        cs_g = _dot(c, wcs_ref[...]) + bcs_ref[...]                   # (G, 2C)
        cs = _dot(oh_b, cs_g)                                         # (N, 2C)
        scale, shift = cs[:, :C], cs[:, C:]

        # --- pre-LN
        o_norm = graph_ln(o)

        # --- GENConv(aggr='add', norm=None, num_layers=1)
        x_src = _dot(oh_src, o_norm)                                  # (E, C) gather
        msg = jnp.maximum(x_src + e, 0.0) + GEN_EPS
        agg = _dotT(oh_dst, msg)                                      # (N, C) scatter-add
        gen_out = _dot(agg + o_norm, gen_w_ref[...]) + gen_b_ref[...]

        # --- TransformerConv: one K=2C fused q/k/v/skip projection (width 4*HC)
        og = jnp.concatenate([o_norm, gen_out], axis=1)               # (N, 2C)
        qkvs = _dot(og, wqkvs_ref[...]) + bqkvs_ref[...]              # (N, 4*HC)
        ee = _dot(e, wedge_ref[...])                                  # (E, HC) lin_edge, no bias

        # Edge gathers hoisted out of the head loop (width HC each).
        q_e = _dot(oh_dst, qkvs[:, 0 * HC:1 * HC])                    # (E, HC)
        k_e = _dot(oh_src, qkvs[:, 1 * HC:2 * HC]) + ee               # (E, HC)
        v_e = _dot(oh_src, qkvs[:, 2 * HC:3 * HC]) + ee               # (E, HC)

        dst_mask = oh_dst > 0.5                                       # (E, N)
        av_cols = []
        for h in range(H):                                            # heads unrolled
            sl = slice(h * C, (h + 1) * C)
            alpha = jnp.sum(q_e[:, sl] * k_e[:, sl], axis=1,
                            keepdims=True) * inv_sqrt_d               # (E, 1)
            # Per-destination softmax (matches PyG softmax). NOTE: every destination
            # has >= 1 incoming edge because self-loops were added, so the masked max
            # below is a true per-destination max (never the -1e30 fill value).
            masked = jnp.where(dst_mask, alpha, NEG_INF)              # (E, N)
            dst_max = jnp.max(masked, axis=0, keepdims=True)          # (1, N)
            edge_max = lax.dot_general(oh_dst, dst_max, (((1,), (1,)), ((), ())),
                                       preferred_element_type=F32)    # (E, 1) gather
            p = jnp.exp(alpha - edge_max)                             # (E, 1)
            denom = _dotT(oh_dst, p)                                  # (N, 1) scatter-add
            a = p * _dot(oh_dst, 1.0 / jnp.maximum(denom, 1e-30))     # (E, 1) exact softmax
            av_cols.append(v_e[:, sl] * a)
        av = jnp.concatenate(av_cols, axis=1)                         # (E, HC)
        head_cat = _dotT(oh_dst, av)                                  # (N, HC) scatter-add
        # Post-attention Linear with the lin_skip term folded into the same matmul.
        l_h = _dot(head_cat + qkvs[:, 3 * HC:4 * HC], wlin_ref[...]) + blin_ref[...]

        # --- FiLM
        o = o + l_h * scale + shift

        # --- pre-LN feed-forward residual (4C lane-dense intermediate)
        o_norm2 = graph_ln(o)
        h1 = _leaky(_dot(o_norm2, wff1_ref[...]) + bff1_ref[...])     # (N, 4C)
        o = o + _dot(h1, wff2_ref[...]) + bff2_ref[...]

        o_ref[...] = o

    return kernel


# ----------------------------------------------------------------------------
# pallas_call wrappers
# ----------------------------------------------------------------------------
def _pcall(kernel, out_shape, *args):
    return pl.pallas_call(
        kernel,
        out_shape=jax.ShapeDtypeStruct(out_shape, F32),
        in_specs=[pl.BlockSpec(memory_space=pltpu.MemorySpace.VMEM)] * len(args),
        out_specs=pl.BlockSpec(memory_space=pltpu.MemorySpace.VMEM),
        compiler_params=pltpu.CompilerParams(vmem_limit_bytes=VMEM_LIMIT),
    )(*args)


def apply_mlp(layers, x):
    """Entire `mlp(...)` chain (Linear + LeakyReLU, no act after last) in ONE kernel."""
    args = [x]
    for lyr in layers:
        args += [lyr["w"], lyr["b"]]
    return _pcall(_make_chain_kernel(len(layers)),
                  (x.shape[0], layers[-1]["w"].shape[1]), *args)


def run_layers(stacked, o0, aug_e, oh_src, oh_dst, oh_b, inv_ng, c, *, num_heads, num_emb):
    """All transformer layers in ONE pallas_call: grid=(num_layers,), one-hots and the
    residual stream stay VMEM-resident across layers."""
    num_layers = stacked["gen_w"].shape[0]
    N, C = o0.shape
    E = aug_e.shape[0]
    G = c.shape[0]
    HC = num_heads * num_emb

    def const_spec(shape):          # fetched once; same block index every layer
        return pl.BlockSpec(shape, lambda l: (0,) * len(shape))

    def layer_spec(shape):          # per-layer stacked weight, leading dim squeezed
        return pl.BlockSpec((None,) + shape, lambda l: (l,) + (0,) * len(shape))

    in_specs = [
        const_spec((N, C)),                 # o0 (read only at layer 0)
        const_spec((E, C)),                 # aug_e
        const_spec((E, N)),                 # oh_src
        const_spec((E, N)),                 # oh_dst
        const_spec((N, G)),                 # oh_b
        const_spec((G, 1)),                 # inv_ng
        const_spec((G, C)),                 # c
        layer_spec((C, C)),                 # gen_w
        layer_spec((1, C)),                 # gen_b
        layer_spec((2 * C, 4 * HC)),        # wqkvs
        layer_spec((1, 4 * HC)),            # bqkvs
        layer_spec((C, HC)),                # wedge
        layer_spec((HC, C)),                # wlin
        layer_spec((1, C)),                 # blin
        layer_spec((C, 4 * C)),             # wff1
        layer_spec((1, 4 * C)),             # bff1
        layer_spec((4 * C, C)),             # wff2
        layer_spec((1, C)),                 # bff2
        layer_spec((C, 2 * C)),             # wcs
        layer_spec((1, 2 * C)),             # bcs
    ]
    # TODO(synk): at realistic E,N add a destination-node-tiled 'parallel' grid axis
    #             (and replace the dense one-hots with a scalar-prefetched CSR
    #             segment-sum) so both v7x TensorCores are used and the working set
    #             fits v7x's 64 MiB VMEM.
    return pl.pallas_call(
        _make_layer_kernel(num_heads, num_emb),
        grid=(num_layers,),
        out_shape=jax.ShapeDtypeStruct((N, C), F32),
        in_specs=in_specs,
        out_specs=pl.BlockSpec((N, C), lambda l: (0, 0)),     # resident accumulator
        compiler_params=pltpu.CompilerParams(
            dimension_semantics=("arbitrary",),
            vmem_limit_bytes=VMEM_LIMIT),
    )(o0, aug_e, oh_src, oh_dst, oh_b, inv_ng, c,
      stacked["gen_w"], stacked["gen_b"], stacked["wqkvs"], stacked["bqkvs"],
      stacked["wedge"], stacked["wlin"], stacked["blin"],
      stacked["wff1"], stacked["bff1"], stacked["wff2"], stacked["bff2"],
      stacked["wcs"], stacked["bcs"])


# ----------------------------------------------------------------------------
# Parameter init (deterministic, synthetic — no checkpoint load)
# ----------------------------------------------------------------------------
def _init_linear(key, n_in, n_out, bias=True):
    k1, k2 = jax.random.split(key)
    bound = 1.0 / math.sqrt(n_in)
    w = jax.random.uniform(k1, (n_in, n_out), F32, -bound, bound)
    b = (jax.random.uniform(k2, (1, n_out), F32, -bound, bound)
         if bias else jnp.zeros((1, n_out), F32))
    return {"w": w, "b": b}


def _init_mlp(key, n_in, n_hid, n_out, n_layer):
    dims = [n_in] + [n_hid] * n_layer + [n_out]
    keys = jax.random.split(key, len(dims) - 1)
    return [_init_linear(k, dims[i], dims[i + 1]) for i, k in enumerate(keys)]


def init_params(key, *, x_dim, e_dim, g_dim, num_emb, num_layers, num_heads,
                num_new_node_values, num_node_attr_logits, num_edge_attr_logits,
                num_mlp_layers):
    C, H = num_emb, num_heads
    HC = H * C
    keys = iter(jax.random.split(key, 9 * num_layers + 16))
    p = {
        "x2h": _init_mlp(next(keys), x_dim, C, C, 2),
        "e2h": _init_mlp(next(keys), e_dim, C, C, 2),
        "c2h": _init_mlp(next(keys), g_dim, C, C, 2),
    }
    layers = []
    for _ in range(num_layers):
        gen = _init_linear(next(keys), C, C)                 # GENConv internal MLP (1 layer)
        q = _init_linear(next(keys), 2 * C, HC)              # TransformerConv.lin_query
        k = _init_linear(next(keys), 2 * C, HC)              # TransformerConv.lin_key
        v = _init_linear(next(keys), 2 * C, HC)              # TransformerConv.lin_value
        skip = _init_linear(next(keys), 2 * C, HC)           # TransformerConv.lin_skip
        edge = _init_linear(next(keys), C, HC, bias=False)   # TransformerConv.lin_edge (no bias)
        lin = _init_linear(next(keys), HC, C)                # nn.Linear(heads*emb, emb)
        ff = _init_mlp(next(keys), C, 4 * C, C, 1)           # mlp(emb, 4*emb, emb, 1)
        cscale = _init_linear(next(keys), C, 2 * C)          # nn.Linear(emb, 2*emb)
        layers.append({
            "gen_w": gen["w"], "gen_b": gen["b"],
            "wqkvs": jnp.concatenate([q["w"], k["w"], v["w"], skip["w"]], axis=1),
            "bqkvs": jnp.concatenate([q["b"], k["b"], v["b"], skip["b"]], axis=1),
            "wedge": edge["w"],
            "wlin": lin["w"], "blin": lin["b"],
            "wff1": ff[0]["w"], "bff1": ff[0]["b"],
            "wff2": ff[1]["w"], "bff2": ff[1]["b"],
            "wcs": cscale["w"], "bcs": cscale["b"],
        })
    # Stack per-layer weights on a leading axis so the layer loop becomes a grid axis.
    p["stacked"] = {name: jnp.stack([lp[name] for lp in layers], axis=0)
                    for name in layers[0]}
    # GFN heads (num_mlp_layers=0 -> single Linear each); edges_are_unordered -> input C.
    p["emb2add_edge"] = _init_mlp(next(keys), C, C, 1, num_mlp_layers)
    p["emb2add_node"] = _init_mlp(next(keys), C, C, num_new_node_values, num_mlp_layers)
    p["emb2set_node_attr"] = _init_mlp(next(keys), C, C, num_node_attr_logits, num_mlp_layers)
    p["emb2set_edge_attr"] = _init_mlp(next(keys), C, C, num_edge_attr_logits, num_mlp_layers)
    p["emb2stop"] = _init_mlp(next(keys), 2 * C, C, 1, num_mlp_layers)
    p["emb2reward"] = _init_mlp(next(keys), 2 * C, C, 1, num_mlp_layers)
    if num_mlp_layers == 0:
        # Hoist head-weight concatenation out of the traced forward (done once here).
        p["node_heads_fused"] = {
            "w": jnp.concatenate([p["emb2add_node"][0]["w"],
                                  p["emb2set_node_attr"][0]["w"]], axis=1),
            "b": jnp.concatenate([p["emb2add_node"][0]["b"],
                                  p["emb2set_node_attr"][0]["b"]], axis=1)}
        p["graph_heads_fused"] = {
            "w": jnp.concatenate([p["emb2stop"][0]["w"],
                                  p["emb2reward"][0]["w"]], axis=1),
            "b": jnp.concatenate([p["emb2stop"][0]["b"],
                                  p["emb2reward"][0]["b"]], axis=1)}
    # TODO(synk): logZ head mlp(g_dim, 2*emb, 1, 2) exists in __init__ but is unused in forward().
    return p


# ----------------------------------------------------------------------------
# GraphTransformer forward (ln_type='pre', num_noise=0)
# ----------------------------------------------------------------------------
def graph_transformer_forward(p, x, edge_attr, edge_index, batch, cond,
                              num_graphs, num_emb, num_heads):
    C, G = num_emb, num_graphs
    N = x.shape[0]

    o = apply_mlp(p["x2h"], x)            # (N, C)
    e = apply_mlp(p["e2h"], edge_attr)    # (E, C)
    c = apply_mlp(p["c2h"], cond)         # (G, C)

    # --- augmented graph construction (pure index glue, plain JAX) ---
    u = jnp.arange(N, dtype=jnp.int32)
    v = batch + N                                                     # virtual node per graph
    aug_src = jnp.concatenate([edge_index[0], u, v])
    aug_dst = jnp.concatenate([edge_index[1], v, u])
    e_p = jnp.zeros((2 * N, C), F32).at[:, 0].set(1.0)
    aug_e = jnp.concatenate([e, e_p], axis=0)
    N_aug = N + G
    # add_self_loops(..., fill_value='mean'): per-target mean of existing edge attrs
    seg_sum = jax.ops.segment_sum(aug_e, aug_dst, num_segments=N_aug)
    seg_cnt = jax.ops.segment_sum(jnp.ones((aug_e.shape[0],), F32), aug_dst,
                                  num_segments=N_aug)
    loop_attr = seg_sum / jnp.maximum(seg_cnt, 1.0)[:, None]
    self_idx = jnp.arange(N_aug, dtype=jnp.int32)
    aug_src = jnp.concatenate([aug_src, self_idx])
    aug_dst = jnp.concatenate([aug_dst, self_idx])
    aug_e = jnp.concatenate([aug_e, loop_attr], axis=0)               # (E_aug, C)
    aug_batch = jnp.concatenate([batch, jnp.arange(G, dtype=jnp.int32)])

    o0 = jnp.concatenate([o, c], axis=0)                              # (N_aug, C)

    # Dense one-hot scatter/gather operands (f32, exactly one copy of each).
    # TODO(synk): replace with scalar-prefetched CSR segment-sum kernels at realistic E,N.
    oh_src = jax.nn.one_hot(aug_src, N_aug, dtype=F32)                # (E_aug, N_aug)
    oh_dst = jax.nn.one_hot(aug_dst, N_aug, dtype=F32)
    oh_b = jax.nn.one_hot(aug_batch, G, dtype=F32)                    # (N_aug, G)
    cnt = jnp.maximum(jnp.sum(oh_b, axis=0), 1.0)                     # (G,)
    inv_ng = (1.0 / (cnt * C))[:, None]                               # (G, 1)

    o_final = run_layers(p["stacked"], o0, aug_e, oh_src, oh_dst, oh_b, inv_ng, c,
                         num_heads=num_heads, num_emb=num_emb)

    node_emb = o_final[:N]                                            # (N, C)
    vnode_emb = o_final[N:]                                           # (G, C)
    return node_emb, vnode_emb


# ----------------------------------------------------------------------------
# GraphTransformerGFN forward
# ----------------------------------------------------------------------------
def gfn_forward(p, g, cond, *, num_graphs, num_emb, num_heads):
    node_emb, vnode_emb = graph_transformer_forward(
        p, g["x"], g["edge_attr"], g["edge_index"], g["batch"], cond,
        num_graphs, num_emb, num_heads)
    G, C = num_graphs, num_emb
    batch = g["batch"]

    # edges_are_unordered=True -> sum of endpoint embeddings
    ne_row, ne_col = g["non_edge_index"][0], g["non_edge_index"][1]
    non_edge_emb = node_emb[ne_row] + node_emb[ne_col]
    # edges_are_duplicated=True -> use every other edge
    e_row, e_col = g["edge_index"][0, ::2], g["edge_index"][1, ::2]
    edge_emb = node_emb[e_row] + node_emb[e_col]

    oh_nb_t = jax.nn.one_hot(batch, G, dtype=F32).T                   # (G, N) real nodes only
    inv_cnt = 1.0 / jnp.maximum(jnp.sum(oh_nb_t, axis=1, keepdims=True), 1.0)

    if "graph_heads_fused" in p:
        # num_mlp_layers == 0: pool fused with stop/reward heads; node heads fused.
        gh = p["graph_heads_fused"]
        yg = _pcall(_pool_heads_kernel, (G, gh["w"].shape[1]),
                    node_emb, oh_nb_t, inv_cnt, vnode_emb, gh["w"], gh["b"])
        n_stop = p["emb2stop"][0]["w"].shape[1]
        stop_l, reward = yg[:, :n_stop], yg[:, n_stop:]
        nh = p["node_heads_fused"]
        yn = apply_mlp([nh], node_emb)
        n_add = p["emb2add_node"][0]["w"].shape[1]
        add_node_l, set_node_attr_l = yn[:, :n_add], yn[:, n_add:]
    else:
        pooled = _pcall(_pool_kernel, (G, C), node_emb, oh_nb_t, inv_cnt)
        graph_emb = jnp.concatenate([pooled, vnode_emb], axis=1)
        stop_l = apply_mlp(p["emb2stop"], graph_emb)
        reward = apply_mlp(p["emb2reward"], graph_emb)
        add_node_l = apply_mlp(p["emb2add_node"], node_emb)
        set_node_attr_l = apply_mlp(p["emb2set_node_attr"], node_emb)

    add_edge_l = apply_mlp(p["emb2add_edge"], non_edge_emb)
    set_edge_attr_l = apply_mlp(p["emb2set_edge_attr"], edge_emb)

    # No *_mask attributes on g -> mask == 1 -> _mask(x, 1) == x (identity).
    logits = {
        "stop": stop_l,
        "add_node": add_node_l,
        "set_node_attr": set_node_attr_l,
        "add_edge": add_edge_l,
        "set_edge_attr": set_edge_attr_l,
    }
    # TODO(synk): GraphActionCategorical is a torch_geometric container object; we return the
    #             raw per-action-type logits + reward instead of packaging them.
    return logits, reward


# ----------------------------------------------------------------------------
if __name__ == "__main__":
    # Synthetic env_ctx / hyper-params (small, consistent with the module)
    X_DIM, E_DIM, G_DIM = 8, 4, 6
    NUM_EMB, NUM_LAYERS, NUM_HEADS, NUM_MLP_LAYERS = 32, 2, 2, 0
    NUM_NEW_NODE_VALUES, NUM_NODE_ATTR_LOGITS, NUM_EDGE_ATTR_LOGITS = 5, 3, 2

    key = jax.random.PRNGKey(0)
    kp, kx, ke, kc = jax.random.split(key, 4)

    params = init_params(
        kp, x_dim=X_DIM, e_dim=E_DIM, g_dim=G_DIM, num_emb=NUM_EMB,
        num_layers=NUM_LAYERS, num_heads=NUM_HEADS,
        num_new_node_values=NUM_NEW_NODE_VALUES,
        num_node_attr_logits=NUM_NODE_ATTR_LOGITS,
        num_edge_attr_logits=NUM_EDGE_ATTR_LOGITS,
        num_mlp_layers=NUM_MLP_LAYERS)

    # Two graphs: graph 0 has nodes {0,1,2}, graph 1 has nodes {3,4}; edges are duplicated.
    g = {
        "x": jax.random.normal(kx, (5, X_DIM), F32),
        "edge_attr": jax.random.normal(ke, (6, E_DIM), F32),
        "edge_index": jnp.array([[0, 1, 1, 2, 3, 4],
                                 [1, 0, 2, 1, 4, 3]], dtype=jnp.int32),
        "batch": jnp.array([0, 0, 0, 1, 1], dtype=jnp.int32),
        "non_edge_index": jnp.array([[0], [2]], dtype=jnp.int32),
    }
    cond = jax.random.normal(kc, (2, G_DIM), F32)

    fwd = jax.jit(gfn_forward, static_argnames=("num_graphs", "num_emb", "num_heads"))
    logits, reward = fwd(params, g, cond, num_graphs=2,
                         num_emb=NUM_EMB, num_heads=NUM_HEADS)
    jax.block_until_ready((logits, reward))

    assert logits["stop"].shape == (2, 1)
    assert logits["add_node"].shape == (5, NUM_NEW_NODE_VALUES)
    assert logits["set_node_attr"].shape == (5, NUM_NODE_ATTR_LOGITS)
    assert logits["add_edge"].shape == (1, 1)
    assert logits["set_edge_attr"].shape == (3, NUM_EDGE_ATTR_LOGITS)
    assert reward.shape == (2, 1)
    for name, val in list(logits.items()) + [("reward", reward)]:
        assert bool(jnp.all(jnp.isfinite(val))), f"non-finite output in {name}"
    print("KERNEL_OK")
</pallas_src>

<mosaic_0001>
module attributes {stable_mosaic.version = 11 : i64} {
  func.func private @main(%arg0: i32) attributes {dimension_semantics = [#tpu.dimension_semantics<core_parallel>], iteration_bounds = array<i64: 2>, tpu.core_type = #tpu.core_type<sc_scalar_subcore>, window_params = []} {
    return
  }
}

module attributes {stable_mosaic.version = 11 : i64} {
  func.func private @main(%arg0: i32) attributes {dimension_semantics = [#tpu.dimension_semantics<core_parallel>], iteration_bounds = array<i64: 2>, tpu.core_type = #tpu.core_type<sc_scalar_subcore>, window_params = []} {
    return
  }
}

module attributes {stable_mosaic.version = 11 : i64} {
  func.func @kernel(%arg0: memref<2x6xf32, #tpu.memory_space<vmem>>, %arg1: memref<6x32xf32, #tpu.memory_space<vmem>>, %arg2: memref<1x32xf32, #tpu.memory_space<vmem>>, %arg3: memref<32x32xf32, #tpu.memory_space<vmem>>, %arg4: memref<1x32xf32, #tpu.memory_space<vmem>>, %arg5: memref<32x32xf32, #tpu.memory_space<vmem>>, %arg6: memref<1x32xf32, #tpu.memory_space<vmem>>, %arg7: memref<2x32xf32, #tpu.memory_space<vmem>>) attributes {dimension_semantics = [], scalar_prefetch = 0 : i64, scratch_operands = 0 : i64, tpu.core_type = #tpu.core_type<tc>} {
    %c0 = arith.constant 0 : index
    %c0_0 = arith.constant 0 : index
    %0 = vector.load %arg0[%c0, %c0_0] : memref<2x6xf32, #tpu.memory_space<vmem>>, vector<2x6xf32>
    %c0_1 = arith.constant 0 : index
    %c0_2 = arith.constant 0 : index
    %1 = vector.load %arg1[%c0_1, %c0_2] : memref<6x32xf32, #tpu.memory_space<vmem>>, vector<6x32xf32>
    %cst = arith.constant dense<0.000000e+00> : vector<2x32xf32>
    %2 = tpu.matmul %0, %1, %cst {dimension_numbers = #tpu.dot_dimension_numbers<[1], [0], [0], [1], [0, 0, 1, 1], [], []>} : vector<2x6xf32>, vector<6x32xf32>, vector<2x32xf32> -> vector<2x32xf32>
    %c0_3 = arith.constant 0 : index
    %c0_4 = arith.constant 0 : index
    %3 = vector.load %arg2[%c0_3, %c0_4] : memref<1x32xf32, #tpu.memory_space<vmem>>, vector<1x32xf32>
    %4 = vector.broadcast %3 : vector<1x32xf32> to vector<2x32xf32>
    %5 = arith.addf %2, %4 : vector<2x32xf32>
    %cst_5 = arith.constant 0.000000e+00 : f32
    %6 = vector.broadcast %cst_5 : f32 to vector<2x32xf32>
    %7 = arith.cmpf oge, %5, %6 : vector<2x32xf32>
    %cst_6 = arith.constant 0.00999999977 : f32
    %8 = vector.broadcast %cst_6 : f32 to vector<2x32xf32>
    %9 = arith.mulf %8, %5 : vector<2x32xf32>
    %10 = arith.select %7, %5, %9 : vector<2x32xi1>, vector<2x32xf32>
    %c0_7 = arith.constant 0 : index
    %c0_8 = arith.constant 0 : index
    %11 = vector.load %arg3[%c0_7, %c0_8] : memref<32x32xf32, #tpu.memory_space<vmem>>, vector<32x32xf32>
    %cst_9 = arith.constant dense<0.000000e+00> : vector<2x32xf32>
    %12 = tpu.matmul %10, %11, %cst_9 {dimension_numbers = #tpu.dot_dimension_numbers<[1], [0], [0], [1], [0, 0, 1, 1], [], []>} : vector<2x32xf32>, vector<32x32xf32>, vector<2x32xf32> -> vector<2x32xf32>
    %c0_10 = arith.constant 0 : index
    %c0_11 = arith.constant 0 : index
    %13 = vector.load %arg4[%c0_10, %c0_11] : memref<1x32xf32, #tpu.memory_space<vmem>>, vector<1x32xf32>
    %14 = vector.broadcast %13 : vector<1x32xf32> to vector<2x32xf32>
    %15 = arith.addf %12, %14 : vector<2x32xf32>
    %cst_12 = arith.constant 0.000000e+00 : f32
    %16 = vector.broadcast %cst_12 : f32 to vector<2x32xf32>
    %17 = arith.cmpf oge, %15, %16 : vector<2x32xf32>
    %cst_13 = arith.constant 0.00999999977 : f32
    %18 = vector.broadcast %cst_13 : f32 to vector<2x32xf32>
    %19 = arith.mulf %18, %15 : vector<2x32xf32>
    %20 = arith.select %17, %15, %19 : vector<2x32xi1>, vector<2x32xf32>
    %c0_14 = arith.constant 0 : index
    %c0_15 = arith.constant 0 : index
    %21 = vector.load %arg5[%c0_14, %c0_15] : memref<32x32xf32, #tpu.memory_space<vmem>>, vector<32x32xf32>
    %cst_16 = arith.constant dense<0.000000e+00> : vector<2x32xf32>
    %22 = tpu.matmul %20, %21, %cst_16 {dimension_numbers = #tpu.dot_dimension_numbers<[1], [0], [0], [1], [0, 0, 1, 1], [], []>} : vector<2x32xf32>, vector<32x32xf32>, vector<2x32xf32> -> vector<2x32xf32>
    %c0_17 = arith.constant 0 : index
    %c0_18 = arith.constant 0 : index
    %23 = vector.load %arg6[%c0_17, %c0_18] : memref<1x32xf32, #tpu.memory_space<vmem>>, vector<1x32xf32>
    %24 = vector.broadcast %23 : vector<1x32xf32> to vector<2x32xf32>
    %25 = arith.addf %22, %24 : vector<2x32xf32>
    %c0_19 = arith.constant 0 : index
    %c0_20 = arith.constant 0 : index
    %26 = vector.load %arg7[%c0_19, %c0_20] : memref<2x32xf32, #tpu.memory_space<vmem>>, vector<2x32xf32>
    tpu.vector_store %arg7[%c0_19, %c0_20], %25 {strides = array<i32>} : memref<2x32xf32, #tpu.memory_space<vmem>>, vector<2x32xf32>,
    return
  }
}

module attributes {stable_mosaic.version = 11 : i64} {
  func.func @kernel(%arg0: memref<5x8xf32, #tpu.memory_space<vmem>>, %arg1: memref<8x32xf32, #tpu.memory_space<vmem>>, %arg2: memref<1x32xf32, #tpu.memory_space<vmem>>, %arg3: memref<32x32xf32, #tpu.memory_space<vmem>>, %arg4: memref<1x32xf32, #tpu.memory_space<vmem>>, %arg5: memref<32x32xf32, #tpu.memory_space<vmem>>, %arg6: memref<1x32xf32, #tpu.memory_space<vmem>>, %arg7: memref<5x32xf32, #tpu.memory_space<vmem>>) attributes {dimension_semantics = [], scalar_prefetch = 0 : i64, scratch_operands = 0 : i64, tpu.core_type = #tpu.core_type<tc>} {
    %c0 = arith.constant 0 : index
    %c0_0 = arith.constant 0 : index
    %0 = vector.load %arg0[%c0, %c0_0] : memref<5x8xf32, #tpu.memory_space<vmem>>, vector<5x8xf32>
    %c0_1 = arith.constant 0 : index
    %c0_2 = arith.constant 0 : index
    %1 = vector.load %arg1[%c0_1, %c0_2] : memref<8x32xf32, #tpu.memory_space<vmem>>, vector<8x32xf32>
    %cst = arith.constant dense<0.000000e+00> : vector<5x32xf32>
    %2 = tpu.matmul %0, %1, %cst {dimension_numbers = #tpu.dot_dimension_numbers<[1], [0], [0], [1], [0, 0, 1, 1], [], []>} : vector<5x8xf32>, vector<8x32xf32>, vector<5x32xf32> -> vector<5x32xf32>
    %c0_3 = arith.constant 0 : index
    %c0_4 = arith.constant 0 : index
    %3 = vector.load %arg2[%c0_3, %c0_4] : memref<1x32xf32, #tpu.memory_space<vmem>>, vector<1x32xf32>
    %4 = vector.broadcast %3 : vector<1x32xf32> to vector<5x32xf32>
    %5 = arith.addf %2, %4 : vector<5x32xf32>
    %cst_5 = arith.constant 0.000000e+00 : f32
    %6 = vector.broadcast %cst_5 : f32 to vector<5x32xf32>
    %7 = arith.cmpf oge, %5, %6 : vector<5x32xf32>
    %cst_6 = arith.constant 0.00999999977 : f32
    %8 = vector.broadcast %cst_6 : f32 to vector<5x32xf32>
    %9 = arith.mulf %8, %5 : vector<5x32xf32>
    %10 = arith.select %7, %5, %9 : vector<5x32xi1>, vector<5x32xf32>
    %c0_7 = arith.constant 0 : index
    %c0_8 = arith.constant 0 : index
    %11 = vector.load %arg3[%c0_7, %c0_8] : memref<32x32xf32, #tpu.memory_space<vmem>>, vector<32x32xf32>
    %cst_9 = arith.constant dense<0.000000e+00> : vector<5x32xf32>
    %12 = tpu.matmul %10, %11, %cst_9 {dimension_numbers = #tpu.dot_dimension_numbers<[1], [0], [0], [1], [0, 0, 1, 1], [], []>} : vector<5x32xf32>, vector<32x32xf32>, vector<5x32xf32> -> vector<5x32xf32>
    %c0_10 = arith.constant 0 : index
    %c0_11 = arith.constant 0 : index
    %13 = vector.load %arg4[%c0_10, %c0_11] : memref<1x32xf32, #tpu.memory_space<vmem>>, vector<1x32xf32>
    %14 = vector.broadcast %13 : vector<1x32xf32> to vector<5x32xf32>
    %15 = arith.addf %12, %14 : vector<5x32xf32>
    %cst_12 = arith.constant 0.000000e+00 : f32
    %16 = vector.broadcast %cst_12 : f32 to vector<5x32xf32>
    %17 = arith.cmpf oge, %15, %16 : vector<5x32xf32>
    %cst_13 = arith.constant 0.00999999977 : f32
    %18 = vector.broadcast %cst_13 : f32 to vector<5x32xf32>
    %19 = arith.mulf %18, %15 : vector<5x32xf32>
    %20 = arith.select %17, %15, %19 : vector<5x32xi1>, vector<5x32xf32>
    %c0_14 = arith.constant 0 : index
    %c0_15 = arith.constant 0 : index
    %21 = vector.load %arg5[%c0_14, %c0_15] : memref<32x32xf32, #tpu.memory_space<vmem>>, vector<32x32xf32>
    %cst_16 = arith.constant dense<0.000000e+00> : vector<5x32xf32>
    %22 = tpu.matmul %20, %21, %cst_16 {dimension_numbers = #tpu.dot_dimension_numbers<[1], [0], [0], [1], [0, 0, 1, 1], [], []>} : vector<5x32xf32>, vector<32x32xf32>, vector<5x32xf32> -> vector<5x32xf32>
    %c0_17 = arith.constant 0 : index
    %c0_18 = arith.constant 0 : index
    %23 = vector.load %arg6[%c0_17, %c0_18] : memref<1x32xf32, #tpu.memory_space<vmem>>, vector<1x32xf32>
    %24 = vector.broadcast %23 : vector<1x32xf32> to vector<5x32xf32>
    %25 = arith.addf %22, %24 : vector<5x32xf32>
    %c0_19 = arith.constant 0 : index
    %c0_20 = arith.constant 0 : index
    %26 = vector.load %arg7[%c0_19, %c0_20] : memref<5x32xf32, #tpu.memory_space<vmem>>, vector<5x32xf32>
    tpu.vector_store %arg7[%c0_19, %c0_20], %25 {strides = array<i32>} : memref<5x32xf32, #tpu.memory_space<vmem>>, vector<5x32xf32>,
    return
  }
}

module attributes {stable_mosaic.version = 11 : i64} {
  func.func @kernel(%arg0: memref<6x4xf32, #tpu.memory_space<vmem>>, %arg1: memref<4x32xf32, #tpu.memory_space<vmem>>, %arg2: memref<1x32xf32, #tpu.memory_space<vmem>>, %arg3: memref<32x32xf32, #tpu.memory_space<vmem>>, %arg4: memref<1x32xf32, #tpu.memory_space<vmem>>, %arg5: memref<32x32xf32, #tpu.memory_space<vmem>>, %arg6: memref<1x32xf32, #tpu.memory_space<vmem>>, %arg7: memref<6x32xf32, #tpu.memory_space<vmem>>) attributes {dimension_semantics = [], scalar_prefetch = 0 : i64, scratch_operands = 0 : i64, tpu.core_type = #tpu.core_type<tc>} {
    %c0 = arith.constant 0 : index
    %c0_0 = arith.constant 0 : index
    %0 = vector.load %arg0[%c0, %c0_0] : memref<6x4xf32, #tpu.memory_space<vmem>>, vector<6x4xf32>
    %c0_1 = arith.constant 0 : index
    %c0_2 = arith.constant 0 : index
    %1 = vector.load %arg1[%c0_1, %c0_2] : memref<4x32xf32, #tpu.memory_space<vmem>>, vector<4x32xf32>
    %cst = arith.constant dense<0.000000e+00> : vector<6x32xf32>
    %2 = tpu.matmul %0, %1, %cst {dimension_numbers = #tpu.dot_dimension_numbers<[1], [0], [0], [1], [0, 0, 1, 1], [], []>} : vector<6x4xf32>, vector<4x32xf32>, vector<6x32xf32> -> vector<6x32xf32>
    %c0_3 = arith.constant 0 : index
    %c0_4 = arith.constant 0 : index
    %3 = vector.load %arg2[%c0_3, %c0_4] : memref<1x32xf32, #tpu.memory_space<vmem>>, vector<1x32xf32>
    %4 = vector.broadcast %3 : vector<1x32xf32> to vector<6x32xf32>
    %5 = arith.addf %2, %4 : vector<6x32xf32>
    %cst_5 = arith.constant 0.000000e+00 : f32
    %6 = vector.broadcast %cst_5 : f32 to vector<6x32xf32>
    %7 = arith.cmpf oge, %5, %6 : vector<6x32xf32>
    %cst_6 = arith.constant 0.00999999977 : f32
    %8 = vector.broadcast %cst_6 : f32 to vector<6x32xf32>
    %9 = arith.mulf %8, %5 : vector<6x32xf32>
    %10 = arith.select %7, %5, %9 : vector<6x32xi1>, vector<6x32xf32>
    %c0_7 = arith.constant 0 : index
    %c0_8 = arith.constant 0 : index
    %11 = vector.load %arg3[%c0_7, %c0_8] : memref<32x32xf32, #tpu.memory_space<vmem>>, vector<32x32xf32>
    %cst_9 = arith.constant dense<0.000000e+00> : vector<6x32xf32>
    %12 = tpu.matmul %10, %11, %cst_9 {dimension_numbers = #tpu.dot_dimension_numbers<[1], [0], [0], [1], [0, 0, 1, 1], [], []>} : vector<6x32xf32>, vector<32x32xf32>, vector<6x32xf32> -> vector<6x32xf32>
    %c0_10 = arith.constant 0 : index
    %c0_11 = arith.constant 0 : index
    %13 = vector.load %arg4[%c0_10, %c0_11] : memref<1x32xf32, #tpu.memory_space<vmem>>, vector<1x32xf32>
    %14 = vector.broadcast %13 : vector<1x32xf32> to vector<6x32xf32>
    %15 = arith.addf %12, %14 : vector<6x32xf32>
    %cst_12 = arith.constant 0.000000e+00 : f32
    %16 = vector.broadcast %cst_12 : f32 to vector<6x32xf32>
    %17 = arith.cmpf oge, %15, %16 : vector<6x32xf32>
    %cst_13 = arith.constant 0.00999999977 : f32
    %18 = vector.broadcast %cst_13 : f32 to vector<6x32xf32>
    %19 = arith.mulf %18, %15 : vector<6x32xf32>
    %20 = arith.select %17, %15, %19 : vector<6x32xi1>, vector<6x32xf32>
    %c0_14 = arith.constant 0 : index
    %c0_15 = arith.constant 0 : index
    %21 = vector.load %arg5[%c0_14, %c0_15] : memref<32x32xf32, #tpu.memory_space<vmem>>, vector<32x32xf32>
    %cst_16 = arith.constant dense<0.000000e+00> : vector<6x32xf32>
    %22 = tpu.matmul %20, %21, %cst_16 {dimension_numbers = #tpu.dot_dimension_numbers<[1], [0], [0], [1], [0, 0, 1, 1], [], []>} : vector<6x32xf32>, vector<32x32xf32>, vector<6x32xf32> -> vector<6x32xf32>
    %c0_17 = arith.constant 0 : index
    %c0_18 = arith.constant 0 : index
    %23 = vector.load %arg6[%c0_17, %c0_18] : memref<1x32xf32, #tpu.memory_space<vmem>>, vector<1x32xf32>
    %24 = vector.broadcast %23 : vector<1x32xf32> to vector<6x32xf32>
    %25 = arith.addf %22, %24 : vector<6x32xf32>
    %c0_19 = arith.constant 0 : index
    %c0_20 = arith.constant 0 : index
    %26 = vector.load %arg7[%c0_19, %c0_20] : memref<6x32xf32, #tpu.memory_space<vmem>>, vector<6x32xf32>
    tpu.vector_store %arg7[%c0_19, %c0_20], %25 {strides = array<i32>} : memref<6x32xf32, #tpu.memory_space<vmem>>, vector<6x32xf32>,
    return
  }
}

module attributes {stable_mosaic.version = 11 : i64} {
  func.func @kernel(%arg0: i32, %arg1: memref<7x32xf32, #tpu.memory_space<vmem>>, %arg2: memref<23x32xf32, #tpu.memory_space<vmem>>, %arg3: memref<23x7xf32, #tpu.memory_space<vmem>>, %arg4: memref<23x7xf32, #tpu.memory_space<vmem>>, %arg5: memref<7x2xf32, #tpu.memory_space<vmem>>, %arg6: memref<2x1xf32, #tpu.memory_space<vmem>>, %arg7: memref<2x32xf32, #tpu.memory_space<vmem>>, %arg8: memref<1x32x32xf32, #tpu.memory_space<vmem>>, %arg9: memref<1x1x32xf32, #tpu.memory_space<vmem>>, %arg10: memref<1x64x256xf32, #tpu.memory_space<vmem>>, %arg11: memref<1x1x256xf32, #tpu.memory_space<vmem>>, %arg12: memref<1x32x64xf32, #tpu.memory_space<vmem>>, %arg13: memref<1x64x32xf32, #tpu.memory_space<vmem>>, %arg14: memref<1x1x32xf32, #tpu.memory_space<vmem>>, %arg15: memref<1x32x128xf32, #tpu.memory_space<vmem>>, %arg16: memref<1x1x128xf32, #tpu.memory_space<vmem>>, %arg17: memref<1x128x32xf32, #tpu.memory_space<vmem>>, %arg18: memref<1x1x32xf32, #tpu.memory_space<vmem>>, %arg19: memref<1x32x64xf32, #tpu.memory_space<vmem>>, %arg20: memref<1x1x64xf32, #tpu.memory_space<vmem>>, %arg21: memref<7x32xf32, #tpu.memory_space<vmem>>) attributes {dimension_semantics = [#tpu.dimension_semantics<arbitrary>], iteration_bounds = array<i64: 2>, scalar_prefetch = 0 : i64, scratch_operands = 0 : i64, tpu.core_type = #tpu.core_type<tc>, window_params = [{pipeline_mode = #tpu.pipeline_mode<synchronous>, transform_indices = @transform_0, window_bounds = array<i64: 7, 32>}, {pipeline_mode = #tpu.pipeline_mode<synchronous>, transform_indices = @transform_1, window_bounds = array<i64: 23, 32>}, {pipeline_mode = #tpu.pipeline_mode<synchronous>, transform_indices = @transform_2, window_bounds = array<i64: 23, 7>}, {pipeline_mode = #tpu.pipeline_mode<synchronous>, transform_indices = @transform_3, window_bounds = array<i64: 23, 7>}, {pipeline_mode = #tpu.pipeline_mode<synchronous>, transform_indices = @transform_4, window_bounds = array<i64: 7, 2>}, {pipeline_mode = #tpu.pipeline_mode<synchronous>, transform_indices = @transform_5, window_bounds = array<i64: 2, 1>}, {pipeline_mode = #tpu.pipeline_mode<synchronous>, transform_indices = @transform_6, window_bounds = array<i64: 2, 32>}, {transform_indices = @transform_7, window_bounds = array<i64: 1, 32, 32>}, {transform_indices = @transform_8, window_bounds = array<i64: 1, 1, 32>}, {transform_indices = @transform_9, window_bounds = array<i64: 1, 64, 256>}, {transform_indices = @transform_10, window_bounds = array<i64: 1, 1, 256>}, {transform_indices = @transform_11, window_bounds = array<i64: 1, 32, 64>}, {transform_indices = @transform_12, window_bounds = array<i64: 1, 64, 32>}, {transform_indices = @transform_13, window_bounds = array<i64: 1, 1, 32>}, {transform_indices = @transform_14, window_bounds = array<i64: 1, 32, 128>}, {transform_indices = @transform_15, window_bounds = array<i64: 1, 1, 128>}, {transform_indices = @transform_16, window_bounds = array<i64: 1, 128, 32>}, {transform_indices = @transform_17, window_bounds = array<i64: 1, 1, 32>}, {transform_indices = @transform_18, window_bounds = array<i64: 1, 32, 64>}, {transform_indices = @transform_19, window_bounds = array<i64: 1, 1, 64>}, {pipeline_mode = #tpu.pipeline_mode<synchronous>, transform_indices = @transform_20, window_bounds = array<i64: 7, 32>}]} {
    %c0_i32 = arith.constant 0 : i32
    %0 = arith.cmpi eq, %arg0, %c0_i32 : i32
    %1 = arith.extui %0 : i1 to i32
    %c0_i32_0 = arith.constant 0 : i32
    %2 = arith.cmpi ne, %1, %c0_i32_0 : i32
    scf.if %2 {
      %c0_105 = arith.constant 0 : index
      %c0_106 = arith.constant 0 : index
      %179 = vector.load %arg1[%c0_105, %c0_106] : memref<7x32xf32, #tpu.memory_space<vmem>>, vector<7x32xf32>
      %c0_107 = arith.constant 0 : index
      %c0_108 = arith.constant 0 : index
      %180 = vector.load %arg21[%c0_107, %c0_108] : memref<7x32xf32, #tpu.memory_space<vmem>>, vector<7x32xf32>
      tpu.vector_store %arg21[%c0_107, %c0_108], %179 {strides = array<i32>} : memref<7x32xf32, #tpu.memory_space<vmem>>, vector<7x32xf32>,
    } else {
    }
    %c0 = arith.constant 0 : index
    %c0_1 = arith.constant 0 : index
    %3 = vector.load %arg21[%c0, %c0_1] : memref<7x32xf32, #tpu.memory_space<vmem>>, vector<7x32xf32>
    %c0_2 = arith.constant 0 : index
    %c0_3 = arith.constant 0 : index
    %4 = vector.load %arg2[%c0_2, %c0_3] : memref<23x32xf32, #tpu.memory_space<vmem>>, vector<23x32xf32>
    %c0_4 = arith.constant 0 : index
    %c0_5 = arith.constant 0 : index
    %5 = vector.load %arg3[%c0_4, %c0_5] : memref<23x7xf32, #tpu.memory_space<vmem>>, vector<23x7xf32>
    %c0_6 = arith.constant 0 : index
    %c0_7 = arith.constant 0 : index
    %6 = vector.load %arg4[%c0_6, %c0_7] : memref<23x7xf32, #tpu.memory_space<vmem>>, vector<23x7xf32>
    %c0_8 = arith.constant 0 : index
    %c0_9 = arith.constant 0 : index
    %7 = vector.load %arg5[%c0_8, %c0_9] : memref<7x2xf32, #tpu.memory_space<vmem>>, vector<7x2xf32>
    %c0_10 = arith.constant 0 : index
    %c0_11 = arith.constant 0 : index
    %8 = vector.load %arg6[%c0_10, %c0_11] : memref<2x1xf32, #tpu.memory_space<vmem>>, vector<2x1xf32>
    %c0_12 = arith.constant 0 : index
    %c0_13 = arith.constant 0 : index
    %9 = vector.load %arg7[%c0_12, %c0_13] : memref<2x32xf32, #tpu.memory_space<vmem>>, vector<2x32xf32>
    %c0_14 = arith.constant 0 : index
    %c0_15 = arith.constant 0 : index
    %c0_16 = arith.constant 0 : index
    %10 = vector.load %arg19[%c0_14, %c0_15, %c0_16] : memref<1x32x64xf32, #tpu.memory_space<vmem>>, vector<1x32x64xf32>
    %11 = vector.shape_cast %10 : vector<1x32x64xf32> to vector<32x64xf32>
    %cst = arith.constant dense<0.000000e+00> : vector<2x64xf32>
    %12 = tpu.matmul %9, %11, %cst {dimension_numbers = #tpu.dot_dimension_numbers<[1], [0], [0], [1], [0, 0, 1, 1], [], []>} : vector<2x32xf32>, vector<32x64xf32>, vector<2x64xf32> -> vector<2x64xf32>
    %c0_17 = arith.constant 0 : index
    %c0_18 = arith.constant 0 : index
    %c0_19 = arith.constant 0 : index
    %13 = vector.load %arg20[%c0_17, %c0_18, %c0_19] : memref<1x1x64xf32, #tpu.memory_space<vmem>>, vector<1x1x64xf32>
    %14 = vector.shape_cast %13 : vector<1x1x64xf32> to vector<1x64xf32>
    %15 = vector.broadcast %14 : vector<1x64xf32> to vector<2x64xf32>
    %16 = arith.addf %12, %15 : vector<2x64xf32>
    %cst_20 = arith.constant dense<0.000000e+00> : vector<7x64xf32>
    %17 = tpu.matmul %7, %16, %cst_20 {dimension_numbers = #tpu.dot_dimension_numbers<[1], [0], [0], [1], [0, 0, 1, 1], [], []>} : vector<7x2xf32>, vector<2x64xf32>, vector<7x64xf32> -> vector<7x64xf32>
    %18 = vector.extract_strided_slice %17 {offsets = [0, 0], sizes = [7, 32], strides = [1, 1]} : vector<7x64xf32> to vector<7x32xf32>
    %19 = vector.extract_strided_slice %17 {offsets = [0, 32], sizes = [7, 32], strides = [1, 1]} : vector<7x64xf32> to vector<7x32xf32>
    %cst_21 = arith.constant dense<0.000000e+00> : vector<2x32xf32>
    %20 = tpu.matmul %7, %3, %cst_21 {dimension_numbers = #tpu.dot_dimension_numbers<[0], [0], [1], [1], [0, 1, 1, 1], [], []>} : vector<7x2xf32>, vector<7x32xf32>, vector<2x32xf32> -> vector<2x32xf32>
    %cst_22 = arith.constant dense<0.000000e+00> : vector<2xf32>
    %21 = vector.multi_reduction <add>, %20, %cst_22 [1] : vector<2x32xf32> to vector<2xf32>
    %22 = vector.shape_cast %21 : vector<2xf32> to vector<2x1xf32>
    %23 = arith.mulf %22, %8 : vector<2x1xf32>
    %cst_23 = arith.constant dense<0.000000e+00> : vector<7x1xf32>
    %24 = tpu.matmul %7, %23, %cst_23 {dimension_numbers = #tpu.dot_dimension_numbers<[1], [0], [0], [1], [0, 0, 1, 1], [], []>} : vector<7x2xf32>, vector<2x1xf32>, vector<7x1xf32> -> vector<7x1xf32>
    %25 = vector.broadcast %24 : vector<7x1xf32> to vector<7x32xf32>
    %26 = arith.subf %3, %25 : vector<7x32xf32>
    %27 = arith.mulf %26, %26 : vector<7x32xf32>
    %cst_24 = arith.constant dense<0.000000e+00> : vector<2x32xf32>
    %28 = tpu.matmul %7, %27, %cst_24 {dimension_numbers = #tpu.dot_dimension_numbers<[0], [0], [1], [1], [0, 1, 1, 1], [], []>} : vector<7x2xf32>, vector<7x32xf32>, vector<2x32xf32> -> vector<2x32xf32>
    %cst_25 = arith.constant dense<0.000000e+00> : vector<2xf32>
    %29 = vector.multi_reduction <add>, %28, %cst_25 [1] : vector<2x32xf32> to vector<2xf32>
    %30 = vector.shape_cast %29 : vector<2xf32> to vector<2x1xf32>
    %31 = arith.mulf %30, %8 : vector<2x1xf32>
    %cst_26 = arith.constant dense<0.000000e+00> : vector<7x1xf32>
    %32 = tpu.matmul %7, %31, %cst_26 {dimension_numbers = #tpu.dot_dimension_numbers<[1], [0], [0], [1], [0, 0, 1, 1], [], []>} : vector<7x2xf32>, vector<2x1xf32>, vector<7x1xf32> -> vector<7x1xf32>
    %cst_27 = arith.constant 9.99999974E-6 : f32
    %33 = vector.broadcast %cst_27 : f32 to vector<7x1xf32>
    %34 = arith.addf %32, %33 : vector<7x1xf32>
    %35 = math.rsqrt %34 : vector<7x1xf32>
    %36 = vector.broadcast %35 : vector<7x1xf32> to vector<7x32xf32>
    %37 = arith.mulf %26, %36 : vector<7x32xf32>
    %cst_28 = arith.constant dense<0.000000e+00> : vector<23x32xf32>
    %38 = tpu.matmul %5, %37, %cst_28 {dimension_numbers = #tpu.dot_dimension_numbers<[1], [0], [0], [1], [0, 0, 1, 1], [], []>} : vector<23x7xf32>, vector<7x32xf32>, vector<23x32xf32> -> vector<23x32xf32>
    %39 = arith.addf %38, %4 : vector<23x32xf32>
    %cst_29 = arith.constant 0.000000e+00 : f32
    %40 = vector.broadcast %cst_29 : f32 to vector<23x32xf32>
    %41 = arith.maximumf %39, %40 : vector<23x32xf32>
    %cst_30 = arith.constant 1.000000e-07 : f32
    %42 = vector.broadcast %cst_30 : f32 to vector<23x32xf32>
    %43 = arith.addf %41, %42 : vector<23x32xf32>
    %cst_31 = arith.constant dense<0.000000e+00> : vector<7x32xf32>
    %44 = tpu.matmul %6, %43, %cst_31 {dimension_numbers = #tpu.dot_dimension_numbers<[0], [0], [1], [1], [0, 1, 1, 1], [], []>} : vector<23x7xf32>, vector<23x32xf32>, vector<7x32xf32> -> vector<7x32xf32>
    %45 = arith.addf %44, %37 : vector<7x32xf32>
    %c0_32 = arith.constant 0 : index
    %c0_33 = arith.constant 0 : index
    %c0_34 = arith.constant 0 : index
    %46 = vector.load %arg8[%c0_32, %c0_33, %c0_34] : memref<1x32x32xf32, #tpu.memory_space<vmem>>, vector<1x32x32xf32>
    %47 = vector.shape_cast %46 : vector<1x32x32xf32> to vector<32x32xf32>
    %cst_35 = arith.constant dense<0.000000e+00> : vector<7x32xf32>
    %48 = tpu.matmul %45, %47, %cst_35 {dimension_numbers = #tpu.dot_dimension_numbers<[1], [0], [0], [1], [0, 0, 1, 1], [], []>} : vector<7x32xf32>, vector<32x32xf32>, vector<7x32xf32> -> vector<7x32xf32>
    %c0_36 = arith.constant 0 : index
    %c0_37 = arith.constant 0 : index
    %c0_38 = arith.constant 0 : index
    %49 = vector.load %arg9[%c0_36, %c0_37, %c0_38] : memref<1x1x32xf32, #tpu.memory_space<vmem>>, vector<1x1x32xf32>
    %50 = vector.shape_cast %49 : vector<1x1x32xf32> to vector<1x32xf32>
    %51 = vector.broadcast %50 : vector<1x32xf32> to vector<7x32xf32>
    %52 = arith.addf %48, %51 : vector<7x32xf32>
    %53 = tpu.concatenate %37, %52 in 1 : vector<7x32xf32>, vector<7x32xf32> -> vector<7x64xf32>
    %c0_39 = arith.constant 0 : index
    %c0_40 = arith.constant 0 : index
    %c0_41 = arith.constant 0 : index
    %54 = vector.load %arg10[%c0_39, %c0_40, %c0_41] : memref<1x64x256xf32, #tpu.memory_space<vmem>>, vector<1x64x256xf32>
    %55 = vector.shape_cast %54 : vector<1x64x256xf32> to vector<64x256xf32>
    %cst_42 = arith.constant dense<0.000000e+00> : vector<7x256xf32>
    %56 = tpu.matmul %53, %55, %cst_42 {dimension_numbers = #tpu.dot_dimension_numbers<[1], [0], [0], [1], [0, 0, 1, 1], [], []>} : vector<7x64xf32>, vector<64x256xf32>, vector<7x256xf32> -> vector<7x256xf32>
    %c0_43 = arith.constant 0 : index
    %c0_44 = arith.constant 0 : index
    %c0_45 = arith.constant 0 : index
    %57 = vector.load %arg11[%c0_43, %c0_44, %c0_45] : memref<1x1x256xf32, #tpu.memory_space<vmem>>, vector<1x1x256xf32>
    %58 = vector.shape_cast %57 : vector<1x1x256xf32> to vector<1x256xf32>
    %59 = vector.broadcast %58 : vector<1x256xf32> to vector<7x256xf32>
    %60 = arith.addf %56, %59 : vector<7x256xf32>
    %c0_46 = arith.constant 0 : index
    %c0_47 = arith.constant 0 : index
    %c0_48 = arith.constant 0 : index
    %61 = vector.load %arg12[%c0_46, %c0_47, %c0_48] : memref<1x32x64xf32, #tpu.memory_space<vmem>>, vector<1x32x64xf32>
    %62 = vector.shape_cast %61 : vector<1x32x64xf32> to vector<32x64xf32>
    %cst_49 = arith.constant dense<0.000000e+00> : vector<23x64xf32>
    %63 = tpu.matmul %4, %62, %cst_49 {dimension_numbers = #tpu.dot_dimension_numbers<[1], [0], [0], [1], [0, 0, 1, 1], [], []>} : vector<23x32xf32>, vector<32x64xf32>, vector<23x64xf32> -> vector<23x64xf32>
    %64 = vector.extract_strided_slice %60 {offsets = [0, 0], sizes = [7, 64], strides = [1, 1]} : vector<7x256xf32> to vector<7x64xf32>
    %cst_50 = arith.constant dense<0.000000e+00> : vector<23x64xf32>
    %65 = tpu.matmul %6, %64, %cst_50 {dimension_numbers = #tpu.dot_dimension_numbers<[1], [0], [0], [1], [0, 0, 1, 1], [], []>} : vector<23x7xf32>, vector<7x64xf32>, vector<23x64xf32> -> vector<23x64xf32>
    %66 = vector.extract_strided_slice %60 {offsets = [0, 64], sizes = [7, 64], strides = [1, 1]} : vector<7x256xf32> to vector<7x64xf32>
    %cst_51 = arith.constant dense<0.000000e+00> : vector<23x64xf32>
    %67 = tpu.matmul %5, %66, %cst_51 {dimension_numbers = #tpu.dot_dimension_numbers<[1], [0], [0], [1], [0, 0, 1, 1], [], []>} : vector<23x7xf32>, vector<7x64xf32>, vector<23x64xf32> -> vector<23x64xf32>
    %68 = arith.addf %67, %63 : vector<23x64xf32>
    %69 = vector.extract_strided_slice %60 {offsets = [0, 128], sizes = [7, 64], strides = [1, 1]} : vector<7x256xf32> to vector<7x64xf32>
    %cst_52 = arith.constant dense<0.000000e+00> : vector<23x64xf32>
    %70 = tpu.matmul %5, %69, %cst_52 {dimension_numbers = #tpu.dot_dimension_numbers<[1], [0], [0], [1], [0, 0, 1, 1], [], []>} : vector<23x7xf32>, vector<7x64xf32>, vector<23x64xf32> -> vector<23x64xf32>
    %71 = arith.addf %70, %63 : vector<23x64xf32>
    %cst_53 = arith.constant 5.000000e-01 : f32
    %72 = vector.broadcast %cst_53 : f32 to vector<23x7xf32>
    %73 = arith.cmpf ogt, %6, %72 : vector<23x7xf32>
    %74 = vector.extract_strided_slice %65 {offsets = [0, 0], sizes = [23, 32], strides = [1, 1]} : vector<23x64xf32> to vector<23x32xf32>
    %75 = vector.extract_strided_slice %68 {offsets = [0, 0], sizes = [23, 32], strides = [1, 1]} : vector<23x64xf32> to vector<23x32xf32>
    %76 = arith.mulf %74, %75 : vector<23x32xf32>
    %cst_54 = arith.constant dense<0.000000e+00> : vector<23xf32>
    %77 = vector.multi_reduction <add>, %76, %cst_54 [1] : vector<23x32xf32> to vector<23xf32>
    %78 = vector.shape_cast %77 : vector<23xf32> to vector<23x1xf32>
    %cst_55 = arith.constant 0.176776692 : f32
    %79 = vector.broadcast %cst_55 : f32 to vector<23x1xf32>
    %80 = arith.mulf %78, %79 : vector<23x1xf32>
    %cst_56 = arith.constant -1.000000e+30 : f32
    %81 = vector.shape_cast %80 : vector<23x1xf32> to vector<23x1xf32>
    %82 = vector.broadcast %81 : vector<23x1xf32> to vector<23x7xf32>
    %83 = vector.broadcast %cst_56 : f32 to vector<23x7xf32>
    %84 = arith.select %73, %82, %83 : vector<23x7xi1>, vector<23x7xf32>
    %cst_57 = arith.constant dense<0xFF800000> : vector<7xf32>
    %85 = vector.multi_reduction <maximumf>, %84, %cst_57 [0] : vector<23x7xf32> to vector<7xf32>
    %86 = vector.shape_cast %85 : vector<7xf32> to vector<1x7xf32>
    %cst_58 = arith.constant dense<0.000000e+00> : vector<23x1xf32>
    %87 = tpu.matmul %6, %86, %cst_58 {dimension_numbers = #tpu.dot_dimension_numbers<[1], [1], [0], [0], [0, 0, 1, 0], [], []>} : vector<23x7xf32>, vector<1x7xf32>, vector<23x1xf32> -> vector<23x1xf32>
    %88 = arith.subf %80, %87 : vector<23x1xf32>
    %89 = math.exp %88 : vector<23x1xf32>
    %cst_59 = arith.constant dense<0.000000e+00> : vector<7x1xf32>
    %90 = tpu.matmul %6, %89, %cst_59 {dimension_numbers = #tpu.dot_dimension_numbers<[0], [0], [1], [1], [0, 1, 1, 1], [], []>} : vector<23x7xf32>, vector<23x1xf32>, vector<7x1xf32> -> vector<7x1xf32>
    %cst_60 = arith.constant 1.000000e-30 : f32
    %91 = vector.broadcast %cst_60 : f32 to vector<7x1xf32>
    %92 = arith.maximumf %90, %91 : vector<7x1xf32>
    %cst_61 = arith.constant 1.000000e+00 : f32
    %93 = vector.broadcast %cst_61 : f32 to vector<7x1xf32>
    %94 = arith.divf %93, %92 : vector<7x1xf32>
    %cst_62 = arith.constant dense<0.000000e+00> : vector<23x1xf32>
    %95 = tpu.matmul %6, %94, %cst_62 {dimension_numbers = #tpu.dot_dimension_numbers<[1], [0], [0], [1], [0, 0, 1, 1], [], []>} : vector<23x7xf32>, vector<7x1xf32>, vector<23x1xf32> -> vector<23x1xf32>
    %96 = arith.mulf %89, %95 : vector<23x1xf32>
    %97 = vector.extract_strided_slice %71 {offsets = [0, 0], sizes = [23, 32], strides = [1, 1]} : vector<23x64xf32> to vector<23x32xf32>
    %98 = vector.broadcast %96 : vector<23x1xf32> to vector<23x32xf32>
    %99 = arith.mulf %97, %98 : vector<23x32xf32>
    %100 = vector.extract_strided_slice %65 {offsets = [0, 32], sizes = [23, 32], strides = [1, 1]} : vector<23x64xf32> to vector<23x32xf32>
    %101 = vector.extract_strided_slice %68 {offsets = [0, 32], sizes = [23, 32], strides = [1, 1]} : vector<23x64xf32> to vector<23x32xf32>
    %102 = arith.mulf %100, %101 : vector<23x32xf32>
    %cst_63 = arith.constant dense<0.000000e+00> : vector<23xf32>
    %103 = vector.multi_reduction <add>, %102, %cst_63 [1] : vector<23x32xf32> to vector<23xf32>
    %104 = vector.shape_cast %103 : vector<23xf32> to vector<23x1xf32>
    %cst_64 = arith.constant 0.176776692 : f32
    %105 = vector.broadcast %cst_64 : f32 to vector<23x1xf32>
    %106 = arith.mulf %104, %105 : vector<23x1xf32>
    %cst_65 = arith.constant -1.000000e+30 : f32
    %107 = vector.shape_cast %106 : vector<23x1xf32> to vector<23x1xf32>
    %108 = vector.broadcast %107 : vector<23x1xf32> to vector<23x7xf32>
    %109 = vector.broadcast %cst_65 : f32 to vector<23x7xf32>
    %110 = arith.select %73, %108, %109 : vector<23x7xi1>, vector<23x7xf32>
    %cst_66 = arith.constant dense<0xFF800000> : vector<7xf32>
    %111 = vector.multi_reduction <maximumf>, %110, %cst_66 [0] : vector<23x7xf32> to vector<7xf32>
    %112 = vector.shape_cast %111 : vector<7xf32> to vector<1x7xf32>
    %cst_67 = arith.constant dense<0.000000e+00> : vector<23x1xf32>
    %113 = tpu.matmul %6, %112, %cst_67 {dimension_numbers = #tpu.dot_dimension_numbers<[1], [1], [0], [0], [0, 0, 1, 0], [], []>} : vector<23x7xf32>, vector<1x7xf32>, vector<23x1xf32> -> vector<23x1xf32>
    %114 = arith.subf %106, %113 : vector<23x1xf32>
    %115 = math.exp %114 : vector<23x1xf32>
    %cst_68 = arith.constant dense<0.000000e+00> : vector<7x1xf32>
    %116 = tpu.matmul %6, %115, %cst_68 {dimension_numbers = #tpu.dot_dimension_numbers<[0], [0], [1], [1], [0, 1, 1, 1], [], []>} : vector<23x7xf32>, vector<23x1xf32>, vector<7x1xf32> -> vector<7x1xf32>
    %cst_69 = arith.constant 1.000000e-30 : f32
    %117 = vector.broadcast %cst_69 : f32 to vector<7x1xf32>
    %118 = arith.maximumf %116, %117 : vector<7x1xf32>
    %cst_70 = arith.constant 1.000000e+00 : f32
    %119 = vector.broadcast %cst_70 : f32 to vector<7x1xf32>
    %120 = arith.divf %119, %118 : vector<7x1xf32>
    %cst_71 = arith.constant dense<0.000000e+00> : vector<23x1xf32>
    %121 = tpu.matmul %6, %120, %cst_71 {dimension_numbers = #tpu.dot_dimension_numbers<[1], [0], [0], [1], [0, 0, 1, 1], [], []>} : vector<23x7xf32>, vector<7x1xf32>, vector<23x1xf32> -> vector<23x1xf32>
    %122 = arith.mulf %115, %121 : vector<23x1xf32>
    %123 = vector.extract_strided_slice %71 {offsets = [0, 32], sizes = [23, 32], strides = [1, 1]} : vector<23x64xf32> to vector<23x32xf32>
    %124 = vector.broadcast %122 : vector<23x1xf32> to vector<23x32xf32>
    %125 = arith.mulf %123, %124 : vector<23x32xf32>
    %126 = tpu.concatenate %99, %125 in 1 : vector<23x32xf32>, vector<23x32xf32> -> vector<23x64xf32>
    %cst_72 = arith.constant dense<0.000000e+00> : vector<7x64xf32>
    %127 = tpu.matmul %6, %126, %cst_72 {dimension_numbers = #tpu.dot_dimension_numbers<[0], [0], [1], [1], [0, 1, 1, 1], [], []>} : vector<23x7xf32>, vector<23x64xf32>, vector<7x64xf32> -> vector<7x64xf32>
    %128 = vector.extract_strided_slice %60 {offsets = [0, 192], sizes = [7, 64], strides = [1, 1]} : vector<7x256xf32> to vector<7x64xf32>
    %129 = arith.addf %127, %128 : vector<7x64xf32>
    %c0_73 = arith.constant 0 : index
    %c0_74 = arith.constant 0 : index
    %c0_75 = arith.constant 0 : index
    %130 = vector.load %arg13[%c0_73, %c0_74, %c0_75] : memref<1x64x32xf32, #tpu.memory_space<vmem>>, vector<1x64x32xf32>
    %131 = vector.shape_cast %130 : vector<1x64x32xf32> to vector<64x32xf32>
    %cst_76 = arith.constant dense<0.000000e+00> : vector<7x32xf32>
    %132 = tpu.matmul %129, %131, %cst_76 {dimension_numbers = #tpu.dot_dimension_numbers<[1], [0], [0], [1], [0, 0, 1, 1], [], []>} : vector<7x64xf32>, vector<64x32xf32>, vector<7x32xf32> -> vector<7x32xf32>
    %c0_77 = arith.constant 0 : index
    %c0_78 = arith.constant 0 : index
    %c0_79 = arith.constant 0 : index
    %133 = vector.load %arg14[%c0_77, %c0_78, %c0_79] : memref<1x1x32xf32, #tpu.memory_space<vmem>>, vector<1x1x32xf32>
    %134 = vector.shape_cast %133 : vector<1x1x32xf32> to vector<1x32xf32>
    %135 = vector.broadcast %134 : vector<1x32xf32> to vector<7x32xf32>
    %136 = arith.addf %132, %135 : vector<7x32xf32>
    %137 = arith.mulf %136, %18 : vector<7x32xf32>
    %138 = arith.addf %3, %137 : vector<7x32xf32>
    %139 = arith.addf %138, %19 : vector<7x32xf32>
    %cst_80 = arith.constant dense<0.000000e+00> : vector<2x32xf32>
    %140 = tpu.matmul %7, %139, %cst_80 {dimension_numbers = #tpu.dot_dimension_numbers<[0], [0], [1], [1], [0, 1, 1, 1], [], []>} : vector<7x2xf32>, vector<7x32xf32>, vector<2x32xf32> -> vector<2x32xf32>
    %cst_81 = arith.constant dense<0.000000e+00> : vector<2xf32>
    %141 = vector.multi_reduction <add>, %140, %cst_81 [1] : vector<2x32xf32> to vector<2xf32>
    %142 = vector.shape_cast %141 : vector<2xf32> to vector<2x1xf32>
    %143 = arith.mulf %142, %8 : vector<2x1xf32>
    %cst_82 = arith.constant dense<0.000000e+00> : vector<7x1xf32>
    %144 = tpu.matmul %7, %143, %cst_82 {dimension_numbers = #tpu.dot_dimension_numbers<[1], [0], [0], [1], [0, 0, 1, 1], [], []>} : vector<7x2xf32>, vector<2x1xf32>, vector<7x1xf32> -> vector<7x1xf32>
    %145 = vector.broadcast %144 : vector<7x1xf32> to vector<7x32xf32>
    %146 = arith.subf %139, %145 : vector<7x32xf32>
    %147 = arith.mulf %146, %146 : vector<7x32xf32>
    %cst_83 = arith.constant dense<0.000000e+00> : vector<2x32xf32>
    %148 = tpu.matmul %7, %147, %cst_83 {dimension_numbers = #tpu.dot_dimension_numbers<[0], [0], [1], [1], [0, 1, 1, 1], [], []>} : vector<7x2xf32>, vector<7x32xf32>, vector<2x32xf32> -> vector<2x32xf32>
    %cst_84 = arith.constant dense<0.000000e+00> : vector<2xf32>
    %149 = vector.multi_reduction <add>, %148, %cst_84 [1] : vector<2x32xf32> to vector<2xf32>
    %150 = vector.shape_cast %149 : vector<2xf32> to vector<2x1xf32>
    %151 = arith.mulf %150, %8 : vector<2x1xf32>
    %cst_85 = arith.constant dense<0.000000e+00> : vector<7x1xf32>
    %152 = tpu.matmul %7, %151, %cst_85 {dimension_numbers = #tpu.dot_dimension_numbers<[1], [0], [0], [1], [0, 0, 1, 1], [], []>} : vector<7x2xf32>, vector<2x1xf32>, vector<7x1xf32> -> vector<7x1xf32>
    %cst_86 = arith.constant 9.99999974E-6 : f32
    %153 = vector.broadcast %cst_86 : f32 to vector<7x1xf32>
    %154 = arith.addf %152, %153 : vector<7x1xf32>
    %155 = math.rsqrt %154 : vector<7x1xf32>
    %156 = vector.broadcast %155 : vector<7x1xf32> to vector<7x32xf32>
    %157 = arith.mulf %146, %156 : vector<7x32xf32>
    %c0_87 = arith.constant 0 : index
    %c0_88 = arith.constant 0 : index
    %c0_89 = arith.constant 0 : index
    %158 = vector.load %arg15[%c0_87, %c0_88, %c0_89] : memref<1x32x128xf32, #tpu.memory_space<vmem>>, vector<1x32x128xf32>
    %159 = vector.shape_cast %158 : vector<1x32x128xf32> to vector<32x128xf32>
    %cst_90 = arith.constant dense<0.000000e+00> : vector<7x128xf32>
    %160 = tpu.matmul %157, %159, %cst_90 {dimension_numbers = #tpu.dot_dimension_numbers<[1], [0], [0], [1], [0, 0, 1, 1], [], []>} : vector<7x32xf32>, vector<32x128xf32>, vector<7x128xf32> -> vector<7x128xf32>
    %c0_91 = arith.constant 0 : index
    %c0_92 = arith.constant 0 : index
    %c0_93 = arith.constant 0 : index
    %161 = vector.load %arg16[%c0_91, %c0_92, %c0_93] : memref<1x1x128xf32, #tpu.memory_space<vmem>>, vector<1x1x128xf32>
    %162 = vector.shape_cast %161 : vector<1x1x128xf32> to vector<1x128xf32>
    %163 = vector.broadcast %162 : vector<1x128xf32> to vector<7x128xf32>
    %164 = arith.addf %160, %163 : vector<7x128xf32>
    %cst_94 = arith.constant 0.000000e+00 : f32
    %165 = vector.broadcast %cst_94 : f32 to vector<7x128xf32>
    %166 = arith.cmpf oge, %164, %165 : vector<7x128xf32>
    %cst_95 = arith.constant 0.00999999977 : f32
    %167 = vector.broadcast %cst_95 : f32 to vector<7x128xf32>
    %168 = arith.mulf %167, %164 : vector<7x128xf32>
    %169 = arith.select %166, %164, %168 : vector<7x128xi1>, vector<7x128xf32>
    %c0_96 = arith.constant 0 : index
    %c0_97 = arith.constant 0 : index
    %c0_98 = arith.constant 0 : index
    %170 = vector.load %arg17[%c0_96, %c0_97, %c0_98] : memref<1x128x32xf32, #tpu.memory_space<vmem>>, vector<1x128x32xf32>
    %171 = vector.shape_cast %170 : vector<1x128x32xf32> to vector<128x32xf32>
    %cst_99 = arith.constant dense<0.000000e+00> : vector<7x32xf32>
    %172 = tpu.matmul %169, %171, %cst_99 {dimension_numbers = #tpu.dot_dimension_numbers<[1], [0], [0], [1], [0, 0, 1, 1], [], []>} : vector<7x128xf32>, vector<128x32xf32>, vector<7x32xf32> -> vector<7x32xf32>
    %173 = arith.addf %139, %172 : vector<7x32xf32>
    %c0_100 = arith.constant 0 : index
    %c0_101 = arith.constant 0 : index
    %c0_102 = arith.constant 0 : index
    %174 = vector.load %arg18[%c0_100, %c0_101, %c0_102] : memref<1x1x32xf32, #tpu.memory_space<vmem>>, vector<1x1x32xf32>
    %175 = vector.shape_cast %174 : vector<1x1x32xf32> to vector<1x32xf32>
    %176 = vector.broadcast %175 : vector<1x32xf32> to vector<7x32xf32>
    %177 = arith.addf %173, %176 : vector<7x32xf32>
    %c0_103 = arith.constant 0 : index
    %c0_104 = arith.constant 0 : index
    %178 = vector.load %arg21[%c0_103, %c0_104] : memref<7x32xf32, #tpu.memory_space<vmem>>, vector<7x32xf32>
    tpu.vector_store %arg21[%c0_103, %c0_104], %177 {strides = array<i32>} : memref<7x32xf32, #tpu.memory_space<vmem>>, vector<7x32xf32>,
    return
  }
  func.func @transform_0(%arg0: i32) -> (i32, i32) {
    %c0_i32 = arith.constant 0 : i32
    %c0_i32_0 = arith.constant 0 : i32
    %c0_i32_1 = arith.constant 0 : i32
    return %c0_i32, %c0_i32_0 : i32, i32
  }
  func.func @transform_1(%arg0: i32) -> (i32, i32) {
    %c0_i32 = arith.constant 0 : i32
    %c0_i32_0 = arith.constant 0 : i32
    %c0_i32_1 = arith.constant 0 : i32
    return %c0_i32, %c0_i32_0 : i32, i32
  }
  func.func @transform_2(%arg0: i32) -> (i32, i32) {
    %c0_i32 = arith.constant 0 : i32
    %c0_i32_0 = arith.constant 0 : i32
    %c0_i32_1 = arith.constant 0 : i32
    return %c0_i32, %c0_i32_0 : i32, i32
  }
  func.func @transform_3(%arg0: i32) -> (i32, i32) {
    %c0_i32 = arith.constant 0 : i32
    %c0_i32_0 = arith.constant 0 : i32
    %c0_i32_1 = arith.constant 0 : i32
    return %c0_i32, %c0_i32_0 : i32, i32
  }
  func.func @transform_4(%arg0: i32) -> (i32, i32) {
    %c0_i32 = arith.constant 0 : i32
    %c0_i32_0 = arith.constant 0 : i32
    %c0_i32_1 = arith.constant 0 : i32
    return %c0_i32, %c0_i32_0 : i32, i32
  }
  func.func @transform_5(%arg0: i32) -> (i32, i32) {
    %c0_i32 = arith.constant 0 : i32
    %c0_i32_0 = arith.constant 0 : i32
    %c0_i32_1 = arith.constant 0 : i32
    return %c0_i32, %c0_i32_0 : i32, i32
  }
  func.func @transform_6(%arg0: i32) -> (i32, i32) {
    %c0_i32 = arith.constant 0 : i32
    %c0_i32_0 = arith.constant 0 : i32
    %c0_i32_1 = arith.constant 0 : i32
    return %c0_i32, %c0_i32_0 : i32, i32
  }
  func.func @transform_7(%arg0: i32) -> (i32, i32, i32) {
    %c0_i32 = arith.constant 0 : i32
    %c0_i32_0 = arith.constant 0 : i32
    %c0_i32_1 = arith.constant 0 : i32
    return %arg0, %c0_i32, %c0_i32_0 : i32, i32, i32
  }
  func.func @transform_8(%arg0: i32) -> (i32, i32, i32) {
    %c0_i32 = arith.constant 0 : i32
    %c0_i32_0 = arith.constant 0 : i32
    %c0_i32_1 = arith.constant 0 : i32
    return %arg0, %c0_i32, %c0_i32_0 : i32, i32, i32
  }
  func.func @transform_9(%arg0: i32) -> (i32, i32, i32) {
    %c0_i32 = arith.constant 0 : i32
    %c0_i32_0 = arith.constant 0 : i32
    %c0_i32_1 = arith.constant 0 : i32
    return %arg0, %c0_i32, %c0_i32_0 : i32, i32, i32
  }
  func.func @transform_10(%arg0: i32) -> (i32, i32, i32) {
    %c0_i32 = arith.constant 0 : i32
    %c0_i32_0 = arith.constant 0 : i32
    %c0_i32_1 = arith.constant 0 : i32
    return %arg0, %c0_i32, %c0_i32_0 : i32, i32, i32
  }
  func.func @transform_11(%arg0: i32) -> (i32, i32, i32) {
    %c0_i32 = arith.constant 0 : i32
    %c0_i32_0 = arith.constant 0 : i32
    %c0_i32_1 = arith.constant 0 : i32
    return %arg0, %c0_i32, %c0_i32_0 : i32, i32, i32
  }
  func.func @transform_12(%arg0: i32) -> (i32, i32, i32) {
    %c0_i32 = arith.constant 0 : i32
    %c0_i32_0 = arith.constant 0 : i32
    %c0_i32_1 = arith.constant 0 : i32
    return %arg0, %c0_i32, %c0_i32_0 : i32, i32, i32
  }
  func.func @transform_13(%arg0: i32) -> (i32, i32, i32) {
    %c0_i32 = arith.constant 0 : i32
    %c0_i32_0 = arith.constant 0 : i32
    %c0_i32_1 = arith.constant 0 : i32
    return %arg0, %c0_i32, %c0_i32_0 : i32, i32, i32
  }
  func.func @transform_14(%arg0: i32) -> (i32, i32, i32) {
    %c0_i32 = arith.constant 0 : i32
    %c0_i32_0 = arith.constant 0 : i32
    %c0_i32_1 = arith.constant 0 : i32
    return %arg0, %c0_i32, %c0_i32_0 : i32, i32, i32
  }
  func.func @transform_15(%arg0: i32) -> (i32, i32, i32) {
    %c0_i32 = arith.constant 0 : i32
    %c0_i32_0 = arith.constant 0 : i32
    %c0_i32_1 = arith.constant 0 : i32
    return %arg0, %c0_i32, %c0_i32_0 : i32, i32, i32
  }
  func.func @transform_16(%arg0: i32) -> (i32, i32, i32) {
    %c0_i32 = arith.constant 0 : i32
    %c0_i32_0 = arith.constant 0 : i32
    %c0_i32_1 = arith.constant 0 : i32
    return %arg0, %c0_i32, %c0_i32_0 : i32, i32, i32
  }
  func.func @transform_17(%arg0: i32) -> (i32, i32, i32) {
    %c0_i32 = arith.constant 0 : i32
    %c0_i32_0 = arith.constant 0 : i32
    %c0_i32_1 = arith.constant 0 : i32
    return %arg0, %c0_i32, %c0_i32_0 : i32, i32, i32
  }
  func.func @transform_18(%arg0: i32) -> (i32, i32, i32) {
    %c0_i32 = arith.constant 0 : i32
    %c0_i32_0 = arith.constant 0 : i32
    %c0_i32_1 = arith.constant 0 : i32
    return %arg0, %c0_i32, %c0_i32_0 : i32, i32, i32
  }
  func.func @transform_19(%arg0: i32) -> (i32, i32, i32) {
    %c0_i32 = arith.constant 0 : i32
    %c0_i32_0 = arith.constant 0 : i32
    %c0_i32_1 = arith.constant 0 : i32
    return %arg0, %c0_i32, %c0_i32_0 : i32, i32, i32
  }
  func.func @transform_20(%arg0: i32) -> (i32, i32) {
    %c0_i32 = arith.constant 0 : i32
    %c0_i32_0 = arith.constant 0 : i32
    %c0_i32_1 = arith.constant 0 : i32
    return %c0_i32, %c0_i32_0 : i32, i32
  }
}

module attributes {stable_mosaic.version = 11 : i64} {
  func.func @kernel(%arg0: memref<3x32xf32, #tpu.memory_space<vmem>>, %arg1: memref<32x2xf32, #tpu.memory_space<vmem>>, %arg2: memref<1x2xf32, #tpu.memory_space<vmem>>, %arg3: memref<3x2xf32, #tpu.memory_space<vmem>>) attributes {dimension_semantics = [], scalar_prefetch = 0 : i64, scratch_operands = 0 : i64, tpu.core_type = #tpu.core_type<tc>} {
    %c0 = arith.constant 0 : index
    %c0_0 = arith.constant 0 : index
    %0 = vector.load %arg0[%c0, %c0_0] : memref<3x32xf32, #tpu.memory_space<vmem>>, vector<3x32xf32>
    %c0_1 = arith.constant 0 : index
    %c0_2 = arith.constant 0 : index
    %1 = vector.load %arg1[%c0_1, %c0_2] : memref<32x2xf32, #tpu.memory_space<vmem>>, vector<32x2xf32>
    %cst = arith.constant dense<0.000000e+00> : vector<3x2xf32>
    %2 = tpu.matmul %0, %1, %cst {dimension_numbers = #tpu.dot_dimension_numbers<[1], [0], [0], [1], [0, 0, 1, 1], [], []>} : vector<3x32xf32>, vector<32x2xf32>, vector<3x2xf32> -> vector<3x2xf32>
    %c0_3 = arith.constant 0 : index
    %c0_4 = arith.constant 0 : index
    %3 = vector.load %arg2[%c0_3, %c0_4] : memref<1x2xf32, #tpu.memory_space<vmem>>, vector<1x2xf32>
    %4 = vector.broadcast %3 : vector<1x2xf32> to vector<3x2xf32>
    %5 = arith.addf %2, %4 : vector<3x2xf32>
    %c0_5 = arith.constant 0 : index
    %c0_6 = arith.constant 0 : index
    %6 = vector.load %arg3[%c0_5, %c0_6] : memref<3x2xf32, #tpu.memory_space<vmem>>, vector<3x2xf32>
    tpu.vector_store %arg3[%c0_5, %c0_6], %5 {strides = array<i32>} : memref<3x2xf32, #tpu.memory_space<vmem>>, vector<3x2xf32>,
    return
  }
}

module attributes {stable_mosaic.version = 11 : i64} {
  func.func @_pool_heads_kernel(%arg0: memref<5x32xf32, #tpu.memory_space<vmem>>, %arg1: memref<2x5xf32, #tpu.memory_space<vmem>>, %arg2: memref<2x1xf32, #tpu.memory_space<vmem>>, %arg3: memref<2x32xf32, #tpu.memory_space<vmem>>, %arg4: memref<64x2xf32, #tpu.memory_space<vmem>>, %arg5: memref<1x2xf32, #tpu.memory_space<vmem>>, %arg6: memref<2x2xf32, #tpu.memory_space<vmem>>) attributes {dimension_semantics = [], scalar_prefetch = 0 : i64, scratch_operands = 0 : i64, tpu.core_type = #tpu.core_type<tc>} {
    %c0 = arith.constant 0 : index
    %c0_0 = arith.constant 0 : index
    %0 = vector.load %arg1[%c0, %c0_0] : memref<2x5xf32, #tpu.memory_space<vmem>>, vector<2x5xf32>
    %c0_1 = arith.constant 0 : index
    %c0_2 = arith.constant 0 : index
    %1 = vector.load %arg0[%c0_1, %c0_2] : memref<5x32xf32, #tpu.memory_space<vmem>>, vector<5x32xf32>
    %cst = arith.constant dense<0.000000e+00> : vector<2x32xf32>
    %2 = tpu.matmul %0, %1, %cst {dimension_numbers = #tpu.dot_dimension_numbers<[1], [0], [0], [1], [0, 0, 1, 1], [], []>} : vector<2x5xf32>, vector<5x32xf32>, vector<2x32xf32> -> vector<2x32xf32>
    %c0_3 = arith.constant 0 : index
    %c0_4 = arith.constant 0 : index
    %3 = vector.load %arg2[%c0_3, %c0_4] : memref<2x1xf32, #tpu.memory_space<vmem>>, vector<2x1xf32>
    %4 = vector.broadcast %3 : vector<2x1xf32> to vector<2x32xf32>
    %5 = arith.mulf %2, %4 : vector<2x32xf32>
    %c0_5 = arith.constant 0 : index
    %c0_6 = arith.constant 0 : index
    %6 = vector.load %arg3[%c0_5, %c0_6] : memref<2x32xf32, #tpu.memory_space<vmem>>, vector<2x32xf32>
    %7 = tpu.concatenate %5, %6 in 1 : vector<2x32xf32>, vector<2x32xf32> -> vector<2x64xf32>
    %c0_7 = arith.constant 0 : index
    %c0_8 = arith.constant 0 : index
    %8 = vector.load %arg4[%c0_7, %c0_8] : memref<64x2xf32, #tpu.memory_space<vmem>>, vector<64x2xf32>
    %cst_9 = arith.constant dense<0.000000e+00> : vector<2x2xf32>
    %9 = tpu.matmul %7, %8, %cst_9 {dimension_numbers = #tpu.dot_dimension_numbers<[1], [0], [0], [1], [0, 0, 1, 1], [], []>} : vector<2x64xf32>, vector<64x2xf32>, vector<2x2xf32> -> vector<2x2xf32>
    %c0_10 = arith.constant 0 : index
    %c0_11 = arith.constant 0 : index
    %10 = vector.load %arg5[%c0_10, %c0_11] : memref<1x2xf32, #tpu.memory_space<vmem>>, vector<1x2xf32>
    %11 = vector.broadcast %10 : vector<1x2xf32> to vector<2x2xf32>
    %12 = arith.addf %9, %11 : vector<2x2xf32>
    %c0_12 = arith.constant 0 : index
    %c0_13 = arith.constant 0 : index
    %13 = vector.load %arg6[%c0_12, %c0_13] : memref<2x2xf32, #tpu.memory_space<vmem>>, vector<2x2xf32>
    tpu.vector_store %arg6[%c0_12, %c0_13], %12 {strides = array<i32>} : memref<2x2xf32, #tpu.memory_space<vmem>>, vector<2x2xf32>,
    return
  }
}

module attributes {stable_mosaic.version = 11 : i64} {
  func.func @kernel(%arg0: memref<5x32xf32, #tpu.memory_space<vmem>>, %arg1: memref<32x8xf32, #tpu.memory_space<vmem>>, %arg2: memref<1x8xf32, #tpu.memory_space<vmem>>, %arg3: memref<5x8xf32, #tpu.memory_space<vmem>>) attributes {dimension_semantics = [], scalar_prefetch = 0 : i64, scratch_operands = 0 : i64, tpu.core_type = #tpu.core_type<tc>} {
    %c0 = arith.constant 0 : index
    %c0_0 = arith.constant 0 : index
    %0 = vector.load %arg0[%c0, %c0_0] : memref<5x32xf32, #tpu.memory_space<vmem>>, vector<5x32xf32>
    %c0_1 = arith.constant 0 : index
    %c0_2 = arith.constant 0 : index
    %1 = vector.load %arg1[%c0_1, %c0_2] : memref<32x8xf32, #tpu.memory_space<vmem>>, vector<32x8xf32>
    %cst = arith.constant dense<0.000000e+00> : vector<5x8xf32>
    %2 = tpu.matmul %0, %1, %cst {dimension_numbers = #tpu.dot_dimension_numbers<[1], [0], [0], [1], [0, 0, 1, 1], [], []>} : vector<5x32xf32>, vector<32x8xf32>, vector<5x8xf32> -> vector<5x8xf32>
    %c0_3 = arith.constant 0 : index
    %c0_4 = arith.constant 0 : index
    %3 = vector.load %arg2[%c0_3, %c0_4] : memref<1x8xf32, #tpu.memory_space<vmem>>, vector<1x8xf32>
    %4 = vector.broadcast %3 : vector<1x8xf32> to vector<5x8xf32>
    %5 = arith.addf %2, %4 : vector<5x8xf32>
    %c0_5 = arith.constant 0 : index
    %c0_6 = arith.constant 0 : index
    %6 = vector.load %arg3[%c0_5, %c0_6] : memref<5x8xf32, #tpu.memory_space<vmem>>, vector<5x8xf32>
    tpu.vector_store %arg3[%c0_5, %c0_6], %5 {strides = array<i32>} : memref<5x8xf32, #tpu.memory_space<vmem>>, vector<5x8xf32>,
    return
  }
}

module attributes {stable_mosaic.version = 11 : i64} {
  func.func @kernel(%arg0: memref<1x32xf32, #tpu.memory_space<vmem>>, %arg1: memref<32x1xf32, #tpu.memory_space<vmem>>, %arg2: memref<1x1xf32, #tpu.memory_space<vmem>>, %arg3: memref<1x1xf32, #tpu.memory_space<vmem>>) attributes {dimension_semantics = [], scalar_prefetch = 0 : i64, scratch_operands = 0 : i64, tpu.core_type = #tpu.core_type<tc>} {
    %c0 = arith.constant 0 : index
    %c0_0 = arith.constant 0 : index
    %0 = vector.load %arg0[%c0, %c0_0] : memref<1x32xf32, #tpu.memory_space<vmem>>, vector<1x32xf32>
    %c0_1 = arith.constant 0 : index
    %c0_2 = arith.constant 0 : index
    %1 = vector.load %arg1[%c0_1, %c0_2] : memref<32x1xf32, #tpu.memory_space<vmem>>, vector<32x1xf32>
    %cst = arith.constant dense<0.000000e+00> : vector<1x1xf32>
    %2 = tpu.matmul %0, %1, %cst {dimension_numbers = #tpu.dot_dimension_numbers<[1], [0], [0], [1], [0, 0, 1, 1], [], []>} : vector<1x32xf32>, vector<32x1xf32>, vector<1x1xf32> -> vector<1x1xf32>
    %c0_3 = arith.constant 0 : index
    %c0_4 = arith.constant 0 : index
    %3 = vector.load %arg2[%c0_3, %c0_4] : memref<1x1xf32, #tpu.memory_space<vmem>>, vector<1x1xf32>
    %4 = arith.addf %2, %3 : vector<1x1xf32>
    %c0_5 = arith.constant 0 : index
    %c0_6 = arith.constant 0 : index
    %5 = vector.load %arg3[%c0_5, %c0_6] : memref<1x1xf32, #tpu.memory_space<vmem>>, vector<1x1xf32>
    tpu.vector_store %arg3[%c0_5, %c0_6], %4 {strides = array<i32>} : memref<1x1xf32, #tpu.memory_space<vmem>>, vector<1x1xf32>,
    return
  }
}

</mosaic_0001>

<bundles_post_ra>
// kernel: gfn_forward.10
= control target key start
LH: loop header
LB: loop body
LE: loop exit
PB: predicated region body
PF: predicated region fallthrough
CT: control target
= control target key end

     0   :  { %vm39_vm0 = vcmask 1045504   ;;  %vm35_vm1 = vcmask 48128   ;;  %v355_v0 = vmov 0.0   ;;  %vm356_vm2 = vmmov 0   ;;  %s440_s1 = inlined_call_operand.vmem [shape: f32[6,32], index: 1, kind: input, shape index: {}]   ;;  %s441_s0 = inlined_call_operand.vmem [shape: f32[2,6], index: 0, kind: input, shape index: {}]   ;;  %s442_s3 = inlined_call_operand.vmem [shape: f32[32,32], index: 3, kind: input, shape index: {}]   ;;  %s443_s5 = inlined_call_operand.vmem [shape: f32[32,32], index: 5, kind: input, shape index: {}]   ;;  %s444_s2 = inlined_call_operand.vmem [shape: f32[1,32], index: 2, kind: input, shape index: {}]   ;;  %s445_s4 = inlined_call_operand.vmem [shape: f32[1,32], index: 4, kind: input, shape index: {}]   ;;  %s446_s6 = inlined_call_operand.vmem [shape: f32[1,32], index: 6, kind: input, shape index: {}]   ;;  %s447_s7 = inlined_call_operand.vmem [shape: f32[2,32], index: 7, kind: output, shape index: {}]  }
   0x1   :  { %313 = vmatprep.subr.mxu0 %v355_v0  ;;  %v27_v1 = vld [vmem:[%s440_s1] sm:$0x3f]  ;;  %315 = vmatprep.mubr.msk.f32.mxu0 %vm356_vm2, %v355_v0  ;;  %v357_v4 = vmov 0.0|0.0   ;;  %v117_v5 = vld [vmem:[%s442_s3 + $0x8] sm:$0xff]  ;;  %v118_v7 = vld [vmem:[%s442_s3 + $0x10] sm:$0xff]  ;;  %vm127_vm4 = vcmask 261120  }
   0x2   :  { %v26_v2 = vld [vmem:[%s441_s0] sm:$0x3]  ;;  %314 = vmatpush3.msk.msra.mxu0 %vm39_vm0, %v27_v1  ;;  %340 = vmatprep.subr.bf16.mxu1 %v357_v4  ;;  %v119_v8 = vld [vmem:[%s442_s3 + $0x18] sm:$0xff]  ;;  %v205_v11 = vld [vmem:[%s443_s5 + $0x8] sm:$0xff]  ;;  %vm288_vm6 = vcmask 254976  }
   0x3   :  { %v116_v3 = vld [vmem:[%s442_s3] sm:$0xff]  ;;  %316 = vmatmul.mubr.msk.f32.vlgmr.msra.gmra.mrb[0].mxu0 %vm35_vm1, %v26_v2  ;;  %326 = vmatprep.mubr.msk.f32.mxu1 %vm356_vm2, %v355_v0  ;;  %v344_v9 = vpack.c.bf16 %v119_v8, %v118_v7  ;;  %v206_v19 = vld [vmem:[%s443_s5 + $0x10] sm:$0xff]  ;;  %v207_v20 = vld [vmem:[%s443_s5 + $0x18] sm:$0xff] }
   0x4   :  { %v341_v6 = vpack.c.bf16 %v117_v5, %v116_v3  ;;  %346 = vmatprep.subr.bf16.mxu0 %v357_v4  ;;  %337 = vmatprep.mubr.msk.f32.mxu0 %vm356_vm2, %v355_v0  ;;  %v204_v10 = vld [vmem:[%s443_s5] sm:$0xff]  ;;  %v350_v21 = vpack.c.bf16 %v207_v20, %v206_v19 }
   0x5   :  { %v347_v12 = vpack.c.bf16 %v205_v11, %v204_v10  ;;  %v294_v13 = vld [vmem:[%s444_s2] ss:$0 sm:$0xff] }
   0x6   :  { %342 = vmatpush3.bf16.msra.mxu1 %v341_v6  ;;  %v297_v22 = vld [vmem:[%s445_s4] ss:$0 sm:$0xff] }
   0x7   :  { %343 = vmatprep.subr.bf16.mxu1 %v357_v4  ;;  %348 = vmatpush3.bf16.msra.mxu0 %v347_v12  ;;  %v299_v28 = vld [vmem:[%s446_s6] ss:$0 sm:$0xff] }
   0x8   :  { %349 = vmatprep.subr.bf16.mxu0 %v357_v4 }
   0xa   :  { %345 = vmatpush3.bf16.msra.mxu1 %v344_v9 }
   0xb   :  { %351 = vmatpush3.bf16.msra.mxu0 %v350_v21 }
  0xd6   :  { %v109_v14 = vpop.f32.mrb[0].mxu0 }
  0xd7   :  { %v110_v15 = vadd.f32 %v294_v13, %v109_v14  ;;  %v317_v16 = vpop.f32.mrb[1].mxu0 }
  0xd9   :  { %vm113_vm3 = vcmp.ge.f32.partialorder %v110_v15, 0.0  ;;  %v114_v17 = vmul.f32 0.01, %v110_v15 }
  0xdb   :  { %v115_v18 = vsel %vm113_vm3, %v110_v15, %v114_v17 }
  0xdc   :  { %327 = vmatmul.mubr.msk.f32.vlgmr.msra.gmra.mrb[0].mxu1 %vm127_vm4, %v115_v18 }
 0x1af   :  { %v197_v23 = vpop.f32.mrb[0].mxu1 }
 0x1b0   :  { %v198_v24 = vadd.f32 %v297_v22, %v197_v23  ;;  %v328_v25 = vpop.f32.mrb[1].mxu1 }
 0x1b2   :  { %vm201_vm5 = vcmp.ge.f32.partialorder %v198_v24, 0.0  ;;  %v202_v26 = vmul.f32 0.01, %v198_v24 }
 0x1b4   :  { %v203_v27 = vsel %vm201_vm5, %v198_v24, %v202_v26 }
 0x1b5   :  { %338 = vmatmul.mubr.msk.f32.vlgmr.msra.gmra.mrb[2].mxu0 %vm127_vm4, %v203_v27 }
 0x288   :  { %v284_v29 = vpop.f32.mrb[2].mxu0 }
 0x289   :  { %v285_v30 = vadd.f32 %v299_v28, %v284_v29  ;;  %v339_v31 = vpop.f32.mrb[3].mxu0 }
 0x28b   :  { %289 = vst.msk [vmem:[%s447_s7] sm:$0x3] %vm288_vm6, %v285_v30 }

// kernel: gfn_forward.8
= control target key start
LH: loop header
LB: loop body
LE: loop exit
PB: predicated region body
PF: predicated region fallthrough
CT: control target
= control target key end

     0   :  { %vm35_vm0 = vcmask 64512   ;;  %v350_v0 = vmov 0.0   ;;  %vm351_vm1 = vmmov 0   ;;  %v352_v4 = vmov 0.0|0.0   ;;  %s435_s1 = inlined_call_operand.vmem [shape: f32[8,32], index: 1, kind: input, shape index: {}]   ;;  %s436_s0 = inlined_call_operand.vmem [shape: f32[5,8], index: 0, kind: input, shape index: {}]   ;;  %s437_s3 = inlined_call_operand.vmem [shape: f32[32,32], index: 3, kind: input, shape index: {}]   ;;  %s438_s5 = inlined_call_operand.vmem [shape: f32[32,32], index: 5, kind: input, shape index: {}]   ;;  %s439_s2 = inlined_call_operand.vmem [shape: f32[1,32], index: 2, kind: input, shape index: {}]   ;;  %s440_s4 = inlined_call_operand.vmem [shape: f32[1,32], index: 4, kind: input, shape index: {}]   ;;  %s441_s6 = inlined_call_operand.vmem [shape: f32[1,32], index: 6, kind: input, shape index: {}]   ;;  %s442_s7 = inlined_call_operand.vmem [shape: f32[5,32], index: 7, kind: output, shape index: {}]  }
   0x1   :  { %308 = vmatprep.subr.mxu0 %v350_v0  ;;  %v27_v1 = vld [vmem:[%s435_s1] sm:$0xff]  ;;  %310 = vmatprep.mubr.msk.f32.mxu0 %vm351_vm1, %v350_v0  ;;  %v113_v5 = vld [vmem:[%s437_s3 + $0x8] sm:$0xff]  ;;  %v114_v7 = vld [vmem:[%s437_s3 + $0x10] sm:$0xff]  ;;  %vm123_vm3 = vcmask 261120   ;;  %vm284_vm5 = vcmask 258048  }
   0x2   :  { %v26_v2 = vld [vmem:[%s436_s0] sm:$0x1f]  ;;  %309 = vmatpush3.msra.mxu0 %v27_v1  ;;  %335 = vmatprep.subr.bf16.mxu1 %v352_v4  ;;  %v115_v8 = vld [vmem:[%s437_s3 + $0x18] sm:$0xff]  ;;  %v201_v11 = vld [vmem:[%s438_s5 + $0x8] sm:$0xff] }
   0x3   :  { %v112_v3 = vld [vmem:[%s437_s3] sm:$0xff]  ;;  %311 = vmatmul.mubr.msk.f32.vlgmr.msra.gmra.mrb[0].mxu0 %vm35_vm0, %v26_v2  ;;  %321 = vmatprep.mubr.msk.f32.mxu1 %vm351_vm1, %v350_v0  ;;  %v339_v9 = vpack.c.bf16 %v115_v8, %v114_v7  ;;  %v202_v19 = vld [vmem:[%s438_s5 + $0x10] sm:$0xff]  ;;  %v203_v20 = vld [vmem:[%s438_s5 + $0x18] sm:$0xff] }
   0x4   :  { %v336_v6 = vpack.c.bf16 %v113_v5, %v112_v3  ;;  %341 = vmatprep.subr.bf16.mxu0 %v352_v4  ;;  %332 = vmatprep.mubr.msk.f32.mxu0 %vm351_vm1, %v350_v0  ;;  %v200_v10 = vld [vmem:[%s438_s5] sm:$0xff]  ;;  %v345_v21 = vpack.c.bf16 %v203_v20, %v202_v19 }
   0x5   :  { %v342_v12 = vpack.c.bf16 %v201_v11, %v200_v10  ;;  %v290_v13 = vld [vmem:[%s439_s2] ss:$0 sm:$0xff] }
   0x6   :  { %337 = vmatpush3.bf16.msra.mxu1 %v336_v6  ;;  %v292_v22 = vld [vmem:[%s440_s4] ss:$0 sm:$0xff] }
   0x7   :  { %338 = vmatprep.subr.bf16.mxu1 %v352_v4  ;;  %343 = vmatpush3.bf16.msra.mxu0 %v342_v12  ;;  %v294_v28 = vld [vmem:[%s441_s6] ss:$0 sm:$0xff] }
   0x8   :  { %344 = vmatprep.subr.bf16.mxu0 %v352_v4 }
   0xa   :  { %340 = vmatpush3.bf16.msra.mxu1 %v339_v9 }
   0xb   :  { %346 = vmatpush3.bf16.msra.mxu0 %v345_v21 }
  0xd6   :  { %v105_v14 = vpop.f32.mrb[0].mxu0 }
  0xd7   :  { %v106_v15 = vadd.f32 %v290_v13, %v105_v14  ;;  %v312_v16 = vpop.f32.mrb[1].mxu0 }
  0xd9   :  { %vm109_vm2 = vcmp.ge.f32.partialorder %v106_v15, 0.0  ;;  %v110_v17 = vmul.f32 0.01, %v106_v15 }
  0xdb   :  { %v111_v18 = vsel %vm109_vm2, %v106_v15, %v110_v17 }
  0xdc   :  { %322 = vmatmul.mubr.msk.f32.vlgmr.msra.gmra.mrb[0].mxu1 %vm123_vm3, %v111_v18 }
 0x1af   :  { %v193_v23 = vpop.f32.mrb[0].mxu1 }
 0x1b0   :  { %v194_v24 = vadd.f32 %v292_v22, %v193_v23  ;;  %v323_v25 = vpop.f32.mrb[1].mxu1 }
 0x1b2   :  { %vm197_vm4 = vcmp.ge.f32.partialorder %v194_v24, 0.0  ;;  %v198_v26 = vmul.f32 0.01, %v194_v24 }
 0x1b4   :  { %v199_v27 = vsel %vm197_vm4, %v194_v24, %v198_v26 }
 0x1b5   :  { %333 = vmatmul.mubr.msk.f32.vlgmr.msra.gmra.mrb[2].mxu0 %vm123_vm3, %v199_v27 }
 0x288   :  { %v280_v29 = vpop.f32.mrb[2].mxu0 }
 0x289   :  { %v281_v30 = vadd.f32 %v294_v28, %v280_v29  ;;  %v334_v31 = vpop.f32.mrb[3].mxu0 }
 0x28b   :  { %285 = vst.msk [vmem:[%s442_s7] sm:$0x1f] %vm284_vm5, %v281_v30 }

// kernel: gfn_forward.9
= control target key start
LH: loop header
LB: loop body
LE: loop exit
PB: predicated region body
PF: predicated region fallthrough
CT: control target
= control target key end

     0   :  { %vm39_vm0 = vcmask 1043456   ;;  %vm35_vm1 = vcmask 31744   ;;  %v355_v0 = vmov 0.0   ;;  %vm356_vm2 = vmmov 0   ;;  %s440_s1 = inlined_call_operand.vmem [shape: f32[4,32], index: 1, kind: input, shape index: {}]   ;;  %s441_s0 = inlined_call_operand.vmem [shape: f32[6,4], index: 0, kind: input, shape index: {}]   ;;  %s442_s3 = inlined_call_operand.vmem [shape: f32[32,32], index: 3, kind: input, shape index: {}]   ;;  %s443_s5 = inlined_call_operand.vmem [shape: f32[32,32], index: 5, kind: input, shape index: {}]   ;;  %s444_s2 = inlined_call_operand.vmem [shape: f32[1,32], index: 2, kind: input, shape index: {}]   ;;  %s445_s4 = inlined_call_operand.vmem [shape: f32[1,32], index: 4, kind: input, shape index: {}]   ;;  %s446_s6 = inlined_call_operand.vmem [shape: f32[1,32], index: 6, kind: input, shape index: {}]   ;;  %s447_s7 = inlined_call_operand.vmem [shape: f32[6,32], index: 7, kind: output, shape index: {}]  }
   0x1   :  { %313 = vmatprep.subr.mxu0 %v355_v0  ;;  %v27_v1 = vld [vmem:[%s440_s1] sm:$0xf]  ;;  %315 = vmatprep.mubr.msk.f32.mxu0 %vm356_vm2, %v355_v0  ;;  %v357_v4 = vmov 0.0|0.0   ;;  %v117_v5 = vld [vmem:[%s442_s3 + $0x8] sm:$0xff]  ;;  %v118_v7 = vld [vmem:[%s442_s3 + $0x10] sm:$0xff]  ;;  %vm127_vm4 = vcmask 261120  }
   0x2   :  { %v26_v2 = vld [vmem:[%s441_s0] sm:$0x3f]  ;;  %314 = vmatpush3.msk.msra.mxu0 %vm39_vm0, %v27_v1  ;;  %340 = vmatprep.subr.bf16.mxu1 %v357_v4  ;;  %v119_v8 = vld [vmem:[%s442_s3 + $0x18] sm:$0xff]  ;;  %v205_v11 = vld [vmem:[%s443_s5 + $0x8] sm:$0xff]  ;;  %vm288_vm6 = vcmask 259072  }
   0x3   :  { %v116_v3 = vld [vmem:[%s442_s3] sm:$0xff]  ;;  %316 = vmatmul.mubr.msk.f32.vlgmr.msra.gmra.mrb[0].mxu0 %vm35_vm1, %v26_v2  ;;  %326 = vmatprep.mubr.msk.f32.mxu1 %vm356_vm2, %v355_v0  ;;  %v344_v9 = vpack.c.bf16 %v119_v8, %v118_v7  ;;  %v206_v19 = vld [vmem:[%s443_s5 + $0x10] sm:$0xff]  ;;  %v207_v20 = vld [vmem:[%s443_s5 + $0x18] sm:$0xff] }
   0x4   :  { %v341_v6 = vpack.c.bf16 %v117_v5, %v116_v3  ;;  %346 = vmatprep.subr.bf16.mxu0 %v357_v4  ;;  %337 = vmatprep.mubr.msk.f32.mxu0 %vm356_vm2, %v355_v0  ;;  %v204_v10 = vld [vmem:[%s443_s5] sm:$0xff]  ;;  %v350_v21 = vpack.c.bf16 %v207_v20, %v206_v19 }
   0x5   :  { %v347_v12 = vpack.c.bf16 %v205_v11, %v204_v10  ;;  %v294_v13 = vld [vmem:[%s444_s2] ss:$0 sm:$0xff] }
   0x6   :  { %342 = vmatpush3.bf16.msra.mxu1 %v341_v6  ;;  %v297_v22 = vld [vmem:[%s445_s4] ss:$0 sm:$0xff] }
   0x7   :  { %343 = vmatprep.subr.bf16.mxu1 %v357_v4  ;;  %348 = vmatpush3.bf16.msra.mxu0 %v347_v12  ;;  %v299_v28 = vld [vmem:[%s446_s6] ss:$0 sm:$0xff] }
   0x8   :  { %349 = vmatprep.subr.bf16.mxu0 %v357_v4 }
   0xa   :  { %345 = vmatpush3.bf16.msra.mxu1 %v344_v9 }
   0xb   :  { %351 = vmatpush3.bf16.msra.mxu0 %v350_v21 }
  0xd6   :  { %v109_v14 = vpop.f32.mrb[0].mxu0 }
  0xd7   :  { %v110_v15 = vadd.f32 %v294_v13, %v109_v14  ;;  %v317_v16 = vpop.f32.mrb[1].mxu0 }
  0xd9   :  { %vm113_vm3 = vcmp.ge.f32.partialorder %v110_v15, 0.0  ;;  %v114_v17 = vmul.f32 0.01, %v110_v15 }
  0xdb   :  { %v115_v18 = vsel %vm113_vm3, %v110_v15, %v114_v17 }
  0xdc   :  { %327 = vmatmul.mubr.msk.f32.vlgmr.msra.gmra.mrb[0].mxu1 %vm127_vm4, %v115_v18 }
 0x1af   :  { %v197_v23 = vpop.f32.mrb[0].mxu1 }
 0x1b0   :  { %v198_v24 = vadd.f32 %v297_v22, %v197_v23  ;;  %v328_v25 = vpop.f32.mrb[1].mxu1 }
 0x1b2   :  { %vm201_vm5 = vcmp.ge.f32.partialorder %v198_v24, 0.0  ;;  %v202_v26 = vmul.f32 0.01, %v198_v24 }
 0x1b4   :  { %v203_v27 = vsel %vm201_vm5, %v198_v24, %v202_v26 }
 0x1b5   :  { %338 = vmatmul.mubr.msk.f32.vlgmr.msra.gmra.mrb[2].mxu0 %vm127_vm4, %v203_v27 }
 0x288   :  { %v284_v29 = vpop.f32.mrb[2].mxu0 }
 0x289   :  { %v285_v30 = vadd.f32 %v299_v28, %v284_v29  ;;  %v339_v31 = vpop.f32.mrb[3].mxu0 }
 0x28b   :  { %289 = vst.msk [vmem:[%s447_s7] sm:$0x3f] %vm288_vm6, %v285_v30 }

// kernel: gfn_forward.15
= control target key start
LH: loop header
LB: loop body
LE: loop exit
PB: predicated region body
PF: predicated region fallthrough
CT: control target
= control target key end

     0   :  { %v133_v0 = vmov 0.0|0.0   ;;  %vm134_vm0 = vmmov 0   ;;  %v135_v4 = vmov 0.0   ;;  %vm26_vm1 = vcmask 261120   ;;  %s177_s1 = inlined_call_operand.vmem [shape: f32[32,2], index: 1, kind: input, shape index: {}]   ;;  %s178_s0 = inlined_call_operand.vmem [shape: f32[3,32], index: 0, kind: input, shape index: {}]   ;;  %s179_s2 = inlined_call_operand.vmem [shape: f32[1,2], index: 2, kind: input, shape index: {}]   ;;  %s180_s3 = inlined_call_operand.vmem [shape: f32[3,2], index: 3, kind: output, shape index: {}]  }
   0x1   :  { %124 = vmatprep.subr.bf16.mxu0 %v133_v0  ;;  %v15_v1 = vld [vmem:[%s177_s1] sm:$0xff]  ;;  %v16_v2 = vld [vmem:[%s177_s1 + $0x8] sm:$0xff]  ;;  %v17_v3 = vld [vmem:[%s177_s1 + $0x10] sm:$0xff]  ;;  %121 = vmatprep.mubr.msk.f32.mxu0 %vm134_vm0, %v135_v4  ;;  %vm100_vm2 = vcmask 10240  }
   0x2   :  { %v125_v5 = vpack.c.bf16 %v16_v2, %v15_v1  ;;  %v18_v6 = vld [vmem:[%s177_s1 + $0x18] sm:$0xff]  ;;  %v14_v8 = vld [vmem:[%s178_s0] sm:$0x7] }
   0x3   :  { %v128_v7 = vpack.c.bf16 %v18_v6, %v17_v3  ;;  %v106_v9 = vld [vmem:[%s179_s2] ss:$0 sm:$0xff] }
   0x4   :  { %126 = vmatpush3.bf16.msra.mxu0 %v125_v5 }
   0x5   :  { %127 = vmatprep.subr.bf16.mxu0 %v133_v0 }
   0x8   :  { %129 = vmatpush3.bf16.msra.mxu0 %v128_v7 }
   0xb   :  { %122 = vmatmul.mubr.msk.f32.vlgmr.msra.gmra.mrb[0].mxu0 %vm26_vm1, %v14_v8 }
  0xde   :  { %v96_v10 = vpop.f32.mrb[0].mxu0 }
  0xdf   :  { %v97_v11 = vadd.f32 %v106_v9, %v96_v10  ;;  %v123_v12 = vpop.f32.mrb[1].mxu0 }
  0xe1   :  { %101 = vst.msk [vmem:[%s180_s3] sm:$0x7] %vm100_vm2, %v97_v11 }

// kernel: gfn_forward.13
= control target key start
LH: loop header
LB: loop body
LE: loop exit
PB: predicated region body
PF: predicated region fallthrough
CT: control target
= control target key end

     0   :  { %v133_v0 = vmov 0.0|0.0   ;;  %vm134_vm0 = vmmov 0   ;;  %v135_v4 = vmov 0.0   ;;  %vm26_vm1 = vcmask 261120   ;;  %s177_s1 = inlined_call_operand.vmem [shape: f32[32,8], index: 1, kind: input, shape index: {}]   ;;  %s178_s0 = inlined_call_operand.vmem [shape: f32[5,32], index: 0, kind: input, shape index: {}]   ;;  %s179_s2 = inlined_call_operand.vmem [shape: f32[1,8], index: 2, kind: input, shape index: {}]   ;;  %s180_s3 = inlined_call_operand.vmem [shape: f32[5,8], index: 3, kind: output, shape index: {}]  }
   0x1   :  { %124 = vmatprep.subr.bf16.mxu0 %v133_v0  ;;  %v15_v1 = vld [vmem:[%s177_s1] sm:$0xff]  ;;  %v16_v2 = vld [vmem:[%s177_s1 + $0x8] sm:$0xff]  ;;  %v17_v3 = vld [vmem:[%s177_s1 + $0x10] sm:$0xff]  ;;  %121 = vmatprep.mubr.msk.f32.mxu0 %vm134_vm0, %v135_v4  ;;  %vm100_vm2 = vcmask 61440  }
   0x2   :  { %v125_v5 = vpack.c.bf16 %v16_v2, %v15_v1  ;;  %v18_v6 = vld [vmem:[%s177_s1 + $0x18] sm:$0xff]  ;;  %v14_v8 = vld [vmem:[%s178_s0] sm:$0x1f] }
   0x3   :  { %v128_v7 = vpack.c.bf16 %v18_v6, %v17_v3  ;;  %v106_v9 = vld [vmem:[%s179_s2] ss:$0 sm:$0xff] }
   0x4   :  { %126 = vmatpush3.bf16.msra.mxu0 %v125_v5 }
   0x5   :  { %127 = vmatprep.subr.bf16.mxu0 %v133_v0 }
   0x8   :  { %129 = vmatpush3.bf16.msra.mxu0 %v128_v7 }
   0xb   :  { %122 = vmatmul.mubr.msk.f32.vlgmr.msra.gmra.mrb[0].mxu0 %vm26_vm1, %v14_v8 }
  0xde   :  { %v96_v10 = vpop.f32.mrb[0].mxu0 }
  0xdf   :  { %v97_v11 = vadd.f32 %v106_v9, %v96_v10  ;;  %v123_v12 = vpop.f32.mrb[1].mxu0 }
  0xe1   :  { %101 = vst.msk [vmem:[%s180_s3] sm:$0x1f] %vm100_vm2, %v97_v11 }

// kernel: gfn_forward.12
= control target key start
LH: loop header
LB: loop body
LE: loop exit
PB: predicated region body
PF: predicated region fallthrough
CT: control target
= control target key end

     0   :  { %vm29_vm0 = vcmask 1044480   ;;  %vm25_vm1 = vcmask 39936   ;;  %v269_v0 = vmov 0.0   ;;  %vm270_vm2 = vmmov 0   ;;  %s273_s10 = smov 32   ;;  %s353_s0 = inlined_call_operand.vmem [shape: f32[5,32], index: 0, kind: input, shape index: {}]   ;;  %s354_s1 = inlined_call_operand.vmem [shape: f32[2,5], index: 1, kind: input, shape index: {}]   ;;  %s355_s2 = inlined_call_operand.vmem [shape: f32[2,1], index: 2, kind: input, shape index: {}]   ;;  %s356_s4 = inlined_call_operand.vmem [shape: f32[64,2], index: 4, kind: input, shape index: {}]   ;;  %s357_s3 = inlined_call_operand.vmem [shape: f32[2,32], index: 3, kind: input, shape index: {}]   ;;  %s358_s5 = inlined_call_operand.vmem [shape: f32[1,2], index: 5, kind: input, shape index: {}]   ;;  %s359_s6 = inlined_call_operand.vmem [shape: f32[2,2], index: 6, kind: output, shape index: {}]  }
   0x1   :  { %227 = vmatprep.subr.mxu0 %v269_v0  ;;  %v24_v1 = vld [vmem:[%s353_s0] sm:$0x1f]  ;;  %229 = vmatprep.mubr.msk.f32.mxu0 %vm270_vm2, %v269_v0  ;;  %v271_v3 = vmov 0   ;;  %v118_v6 = vld [vmem:[%s356_s4 + $0x8] sm:$0xff]  ;;  %v119_v7 = vld [vmem:[%s356_s4 + $0x10] sm:$0xff]  ;;  %v272_v10 = vmov 0.0|0.0  }
   0x2   :  { %v23_v2 = vld [vmem:[%s354_s1] sm:$0x3]  ;;  %228 = vmatpush3.msk.msra.mxu0 %vm29_vm0, %v24_v1  ;;  %268 = vset.pattern.permute.xlu0 %v271_v3  ;;  %v120_v8 = vld [vmem:[%s356_s4 + $0x18] sm:$0xff]  ;;  %v122_v14 = vld [vmem:[%s356_s4 + $0x28] sm:$0xff]  ;;  %vm115_vm3 = vcmask 261120   ;;  %vm132_vm4 = vcmask 523264  }
   0x3   :  { %v103_v4 = vld [vmem:[%s355_s2] sm:$0x3]  ;;  %230 = vmatmul.mubr.msk.f32.vlgmr.msra.gmra.mrb[0].mxu0 %vm25_vm1, %v23_v2  ;;  %251 = vmatprep.subr.bf16.mxu1 %v272_v10  ;;  %v255_v12 = vpack.c.bf16 %v120_v8, %v119_v7  ;;  %v123_v16 = vld [vmem:[%s356_s4 + $0x30] sm:$0xff]  ;;  %v124_v17 = vld [vmem:[%s356_s4 + $0x38] sm:$0xff]  ;;  %vm206_vm5 = vcmask 9216  }
   0x4   :  { %v117_v5 = vld [vmem:[%s356_s4] sm:$0xff]  ;;  %106 = vperm.xlu0 %268, %v103_v4   ;;  %248 = vmatprep.mubr.msk.f32.mxu1 %vm270_vm2, %v269_v0  ;;  %v261_v18 = vpack.c.bf16 %v124_v17, %v123_v16 }
   0x5   :  { %v110_v9 = vld [vmem:[%s357_s3] sm:$0x3]  ;;  %v252_v11 = vpack.c.bf16 %v118_v6, %v117_v5 }
   0x6   :  { %v121_v13 = vld [vmem:[%s356_s4 + $0x20] sm:$0xff] }
   0x7   :  { %253 = vmatpush3.bf16.msra.mxu1 %v252_v11  ;;  %v258_v15 = vpack.c.bf16 %v122_v14, %v121_v13  ;;  %v214_v25 = vld [vmem:[%s358_s5] ss:$0 sm:$0xff] }
   0x8   :  { %112 = vrot.lane.b32.xlu0 %v110_v9, %s273_s10  ;;  %254 = vmatprep.subr.bf16.mxu1 %v272_v10 }
   0xb   :  { %256 = vmatpush3.bf16.msra.mxu1 %v255_v12 }
   0xc   :  { %257 = vmatprep.subr.bf16.mxu1 %v272_v10 }
   0xf   :  { %259 = vmatpush3.bf16.msra.mxu1 %v258_v15 }
  0x10   :  { %260 = vmatprep.subr.bf16.mxu1 %v272_v10 }
  0x13   :  { %262 = vmatpush3.bf16.msra.mxu1 %v261_v18 }
  0x83   :  { %v107_v19 = vpop.permute.xlu0 %106 }
  0x87   :  { %v113_v21 = vpop.permute.xlu0 %112 }
  0xd6   :  { %v99_v20 = vpop.f32.mrb[0].mxu0 }
  0xd7   :  { %v109_v22 = vmul.f32 %v107_v19, %v99_v20  ;;  %v231_v23 = vpop.f32.mrb[1].mxu0 }
  0xd9   :  { %v116_v24 = vsel %vm115_vm3, %v109_v22, %v113_v21 }
  0xda   :  { %249 = vmatmul.mubr.msk.f32.vlgmr.msra.gmra.mrb[0].mxu1 %vm132_vm4, %v116_v24 }
 0x1ad   :  { %v202_v26 = vpop.f32.mrb[0].mxu1 }
 0x1ae   :  { %v203_v27 = vadd.f32 %v214_v25, %v202_v26  ;;  %v250_v28 = vpop.f32.mrb[1].mxu1 }
 0x1b0   :  { %207 = vst.msk [vmem:[%s359_s6] sm:$0x3] %vm206_vm5, %v203_v27 }

// kernel: gfn_forward.11
= control target key start
LH: loop header
LB: loop body
LE: loop exit
PB: predicated region body
PF: predicated region fallthrough
CT: control target
= control target key end

     0   :  { %s4664_s0 = inlined_call_operand.vmem [shape: f32[7,32], index: 0, kind: input, shape index: {}]   ;;  %s4665_s1 = inlined_call_operand.vmem [shape: f32[23,32], index: 1, kind: input, shape index: {}]   ;;  %s4666_s2 = inlined_call_operand.vmem [shape: f32[23,7], index: 2, kind: input, shape index: {}]   ;;  %s4667_s3 = inlined_call_operand.vmem [shape: f32[23,7], index: 3, kind: input, shape index: {}]   ;;  %s4668_s4 = inlined_call_operand.vmem [shape: f32[7,2], index: 4, kind: input, shape index: {}]   ;;  %s4669_s5 = inlined_call_operand.vmem [shape: f32[2,1], index: 5, kind: input, shape index: {}]   ;;  %s4670_s6 = inlined_call_operand.vmem [shape: f32[2,32], index: 6, kind: input, shape index: {}]   ;;  %s4671_s7 = inlined_call_operand.vmem [shape: f32[2,32,32], index: 7, kind: input, shape index: {}]   ;;  %s4672_s8 = inlined_call_operand.vmem [shape: f32[2,1,32], index: 8, kind: input, shape index: {}]   ;;  %s4673_s9 = inlined_call_operand.vmem [shape: f32[2,64,256], index: 9, kind: input, shape index: {}]   ;;  %s4674_s10 = inlined_call_operand.vmem [shape: f32[2,1,256], index: 10, kind: input, shape index: {}]   ;;  %s4675_s11 = inlined_call_operand.vmem [shape: f32[2,32,64], index: 11, kind: input, shape index: {}]   ;;  %s4676_s12 = inlined_call_operand.vmem [shape: f32[2,64,32], index: 12, kind: input, shape index: {}]   ;;  %s4677_s13 = inlined_call_operand.vmem [shape: f32[2,1,32], index: 13, kind: input, shape index: {}]   ;;  %s4678_s14 = inlined_call_operand.vmem [shape: f32[2,32,128], index: 14, kind: input, shape index: {}]   ;;  %s4679_s15 = inlined_call_operand.vmem [shape: f32[2,1,128], index: 15, kind: input, shape index: {}]   ;;  %s4680_s16 = inlined_call_operand.vmem [shape: f32[2,128,32], index: 16, kind: input, shape index: {}]   ;;  %s4681_s17 = inlined_call_operand.vmem [shape: f32[2,1,32], index: 17, kind: input, shape index: {}]   ;;  %s4682_s18 = inlined_call_operand.vmem [shape: f32[2,32,64], index: 18, kind: input, shape index: {}]   ;;  %s4683_s19 = inlined_call_operand.vmem [shape: f32[2,1,64], index: 19, kind: input, shape index: {}]   ;;  %s4684_s20 = inlined_call_operand.vmem [shape: f32[7,32], index: 20, kind: output, shape index: {}]  }
   0x1   :  { %4692 = sst [smem:[#allocation5_spill]] %s4664_s0 }
   0x2   :  { %4693 = sst [smem:[#allocation6_spill]] %s4665_s1  ;;  %s4105_s1 = smov 0  }
   0x3   :  { %4694 = sst [smem:[#allocation7_spill]] %s4666_s2 }
   0x4   :  { %4695 = sst [smem:[#allocation8_spill]] %s4667_s3 }
   0x5   :  { %4696 = sst [smem:[#allocation9_spill]] %s4668_s4 }
   0x6   :  { %4697 = sst [smem:[#allocation10_spill]] %s4669_s5 }
   0x7   :  { %4698 = sst [smem:[#allocation11_spill]] %s4670_s6 }
   0x8   :  { %4699 = sst [smem:[#allocation12_spill]] %s4671_s7 }
   0x9   :  { %4700 = sst [smem:[#allocation13_spill]] %s4672_s8 }
   0xa   :  { %4701 = sst [smem:[#allocation14_spill]] %s4673_s9 }
   0xb   :  { %4702 = sst [smem:[#allocation15_spill]] %s4674_s10 }
   0xc   :  { %4703 = sst [smem:[#allocation16_spill]] %s4675_s11 }
   0xd   :  { %4704 = sst [smem:[#allocation17_spill]] %s4676_s12 }
   0xe LB: > { %4705 = sst [smem:[#allocation2_spill]] %s3991_s1  ;;  %s3410_s22 = sadd.s32 4294967295, %s3991_s1   ;;  %s3991_s1 = sphi %s4105_s1, %s30_s1  }
   0xf   : > { %p3413_p0 = scmp.ge.s32.totalorder %s3991_s1, 1  ;;  %p666_p1 = scmp.lt.s32.totalorder %s3991_s1, 3 }
  0x11   : > { %p667_p2 = pnand %p3413_p0, %p666_p1 }
  0x13   : > { %670 = sbr.rel (%p667_p2) target bundleno = 6338 (0x18c2), region = 100 }
  0x1a   : > { %p768_p3 = scmp.lt.s32.totalorder %s3410_s22, 1  ;;  %s4707_s7 = sld [smem:[#allocation12_spill]] }
  0x1b   : > { %s4709_s9 = sld [smem:[#allocation14_spill]]  ;;  %s4711_s10 = sld [smem:[#allocation15_spill]] }
  0x1c   : > { %s4113_s23 = scalar_select %p768_p3, %s3410_s22, 1 }
  0x1d   : > { %s4712_s11 = sld [smem:[#allocation16_spill]]  ;;  %s4713_s12 = sld [smem:[#allocation17_spill]] }
  0x1e   : > { %s3495_s24 = sshll.u32 %s4113_s23, 5  ;;  %s3496_s4 = sshll.u32 %s4113_s23, 7 }
  0x1f   : > { %s3418_s21 = sshll.u32 %s4113_s23, 1  ;;  %s3498_s26 = sshll.u32 %s4113_s23, 6 }
  0x20   : > { %s4123_s28 = scalar_lea.vmem %s4707_s7, %s3495_s24  ;;  %s4155_s5 = scalar_lea.vmem %s4678_s14, %s3495_s24 }
  0x21   : > { %4708 = sst [smem:[#allocation3_spill]] %s4123_s28  ;;  %s4129_s0 = scalar_lea.vmem %s4709_s9, %s3496_s4 }
  0x22   : > { %4710 = sst [smem:[#allocation4_spill]] %s4129_s0  ;;  %s4135_s6 = scalar_lea.vmem %s4711_s10, %s3418_s21 }
  0x23   : > { %s4140_s3 = scalar_lea.vmem %s4712_s11, %s3495_s24  ;;  %s4150_s30 = scalar_lea.vmem %s4713_s12, %s3498_s26 }
  0x24   : > { %s4164_s11 = scalar_lea.vmem %s4680_s16, %s3496_s4  ;;  %s813_s28 = scalar_lea.vmem %s4681_s17, %s4113_s23 }
  0x25   : > { %s818_s8 = scalar_lea.vmem %s4682_s18, %s3495_s24  ;;  %s821_s12 = scalar_lea.vmem %s4683_s19, %s4113_s23 }
  0x26   : > { %p3429_p4 = scmp.ne.s32.totalorder %s3410_s22, 0 }
  0x27   : > { %s4714_s2 = sld [smem:[#allocation5_spill]] (!%p3429_p4)  ;;  %vm827_vm0 = vcmask (!%p3429_p4), 260096  }
  0x28   : > { %825 = sbr.rel (%p3429_p4) target bundleno = 47 (0x2f), region = 104 }
  0x2d   : > { %v826_v0 = vld [vmem:[%s4714_s2] sm:$0x7f] (!%p3429_p4) }
  0x2e   : > { %828 = vst.msk [vmem:[%s4684_s20] sm:$0x7f] (!%p3429_p4), %vm827_vm0, %v826_v0 }
  0x2f PF: > { %v842_v1 = vld [vmem:[%s818_s8] sm:$0xff]  ;;  %v843_v2 = vld [vmem:[%s818_s8 + $0x8] sm:$0xff]  ;;  %v844_v3 = vld [vmem:[%s818_s8 + $0x10] sm:$0xff]  ;;  %v3993_v4 = vmov 0.0|0.0   ;;  %vm3994_vm1 = vmmov 0   ;;  %v3995_v7 = vmov 0.0   ;;  %s4725_s4 = scalar_lea.vmem %s4677_s13, %s4113_s23  ;;  %s4726_s25 = scalar_lea.vmem %s4679_s15, %s4113_s23 }
  0x30   : > { %3859 = vmatprep.subr.bf16.mxu0 %v3993_v4  ;;  %v3860_v5 = vpack.c.bf16 %v843_v2, %v842_v1  ;;  %v845_v6 = vld [vmem:[%s818_s8 + $0x18] sm:$0xff]  ;;  %3616 = vmatprep.mubr.msk.f32.mxu0 %vm3994_vm1, %v3995_v7  ;;  %s4715_s2 = sld [smem:[#allocation9_spill]]  ;;  %s4716_s7 = sld [smem:[#allocation11_spill]]  ;;  %vm853_vm2 = vcmask 261120   ;;  %v3430_v11 = vld [vmem:[%s821_s12] ss:$0 sm:$0xff] }
  0x31   : > { %3619 = vmatprep.subr.mxu1 %v3995_v7  ;;  %v3863_v9 = vpack.c.bf16 %v845_v6, %v844_v3  ;;  %3621 = vmatprep.mubr.msk.f32.mxu1 %vm3994_vm1, %v3995_v7  ;;  %vm931_vm3 = vcmask 1041408   ;;  %vm927_vm4 = vcmask 15360   ;;  %vm1041_vm5 = vcmask 1046528   ;;  %s4717_s9 = sld [smem:[#allocation10_spill]]  ;;  %s4718_s21 = sld [smem:[#allocation8_spill]] }
  0x32   : > { %3861 = vmatpush3.bf16.msra.mxu0 %v3860_v5  ;;  %vm1037_vm6 = vcmask 56320   ;;  %vm1115_vm7 = vcmask 254976   ;;  %v3996_v22 = vmov 0   ;;  %s4719_s8 = sld [smem:[#allocation3_spill]]  ;;  %s4720_s27 = sld [smem:[#allocation7_spill]]  ;;  %vm1487_vm8 = vcmask 187392  }
  0x33   : > { %3862 = vmatprep.subr.bf16.mxu0 %v3993_v4  ;;  %3962 = vset.pattern.permute.xlu1 %v3996_v22  ;;  %s4721_s10 = sld [smem:[#allocation6_spill]]  ;;  %s4723_s12 = sld [smem:[#allocation13_spill]]  ;;  %vm1681_vm9 = vcmask 523264   ;;  %vm2120_vm10 = vcmask 260096   ;;  %vm2132_vm14 = vcmask 55296  }
  0x35   : > { %v4206_v15 = vld [vmem:[%s4684_s20] sm:$0x7f] }
  0x36   : > { %v4189_v8 = vld [vmem:[%s4715_s2] sm:$0x7f]  ;;  %3864 = vmatpush3.bf16.msra.mxu0 %v3863_v9 }
  0x37   : > { %1005 = vxpose.xlu0.b32.start.end [1/1] (short) (narrow) %v4189_v8, 8  ;;  %v841_v10 = vld [vmem:[%s4716_s7] sm:$0x3]  ;;  %3634 = vmatprep.subr.mxu0 %v3995_v7  ;;  %v4262_v41 = vld [vmem:[%s4718_s21 + $0x8] sm:$0xff]  ;;  %v4268_v42 = vld [vmem:[%s4718_s21 + $0x10] sm:$0x7f] }
  0x38   : > { %v4229_v23 = vld [vmem:[%s4717_s9] sm:$0x3]  ;;  %v4288_v46 = vld [vmem:[%s4720_s27 + $0x8] sm:$0xff]  ;;  %v4297_v47 = vld [vmem:[%s4720_s27 + $0x10] sm:$0x7f]  ;;  %s4722_s7 = sld [smem:[#allocation4_spill]] }
  0x39   : > { %3617 = vmatmul.mubr.msk.f32.vlgmr.msra.gmra.mrb[0].mxu0 %vm853_vm2, %v841_v10  ;;  %v4256_v40 = vld [vmem:[%s4718_s21] sm:$0xff]  ;;  %v1565_v49 = vld [vmem:[%s4719_s8 + $0x8] sm:$0xff]  ;;  %v4321_v60 = vld [vmem:[%s4721_s10 + $0x10] sm:$0x7f]  ;;  %s4724_s29 = scalar_lea.vmem %s4723_s12, %s4113_s23  ;;  %s3998_s9 = smov 64   ;;  %vm2109_vm11 = vcmp.gt.f32.partialorder %v4262_v41, 0.5 }
  0x3a   : > { %3636 = vmatprep.mubr.msk.f32.mxu0 %vm3994_vm1, %v3995_v7  ;;  %v4276_v45 = vld [vmem:[%s4720_s27] sm:$0xff]  ;;  %v4315_v55 = vld [vmem:[%s4721_s10 + $0x8] sm:$0xff]  ;;  %v1566_v10 = vld [vmem:[%s4719_s8 + $0x10] sm:$0xff]  ;;  %vm2108_vm12 = vcmp.gt.f32.partialorder %v4256_v40, 0.5  ;;  %vm2110_vm13 = vcmp.gt.f32.partialorder %v4268_v42, 0.5 }
  0x3b   : > { %v1564_v48 = vld [vmem:[%s4719_s8] sm:$0xff] }
  0x3c   : > { %v3869_v50 = vpack.c.bf16 %v1565_v49, %v1564_v48  ;;  %v4309_v51 = vld [vmem:[%s4721_s10] sm:$0xff] }
  0x3e   : > { %v1665_v48 = vld [vmem:[%s4722_s7 + $0x60] sm:$0xff]  ;;  %v1667_v49 = vld [vmem:[%s4722_s7 + $0x70] sm:$0xff] }
  0xb7   : > { %v4212_v16 = vpop.trf.xlu0 }
 0x10c   : > { %v923_v12 = vpop.f32.mrb[0].mxu0 }
 0x10d   : > { %v924_v13 = vadd.f32 %v3430_v11, %v923_v12  ;;  %v3618_v14 = vpop.f32.mrb[1].mxu0  ;;  %v1567_v11 = vld [vmem:[%s4719_s8 + $0x18] sm:$0xff] }
 0x10e   : > { %v3872_v12 = vpack.c.bf16 %v1567_v11, %v1566_v10 }
 0x10f   : > { %3620 = vmatpush3.msk.msra.mxu1 %vm931_vm3, %v924_v13 }
 0x110   : > { %3622 = vmatmul.mubr.msk.f32.vlgmr.msra.gmra.mrb[0].mxu1 %vm927_vm4, %v4189_v8  ;;  %3624 = vmatprep.subr.mxu1 %v3995_v7 }
 0x111   : > { %3625 = vmatpush3.msk.msra.mxu1 %vm1041_vm5, %v4206_v15  ;;  %3626 = vmatprep.mubr.msk.f32.mxu1 %vm3994_vm1, %v3995_v7 }
 0x112   : > { %3629 = vmatprep.subr.mxu1 %v3995_v7 }
 0x114   : > { %3627 = vmatmul.mubr.msk.f32.vlgmr.msra.gmra.mrb[2].mxu1 %vm1037_vm6, %v4212_v16 }
 0x115   : > { %3631 = vmatprep.mubr.msk.f32.mxu1 %vm3994_vm1, %v3995_v7 }
 0x1e3   : > { %v4223_v17 = vpop.f32.mrb[0].mxu1 }
 0x1e4   : > { %v3623_v18 = vpop.f32.mrb[1].mxu1 }
 0x1e7   : > { %v1111_v19 = vpop.f32.mrb[2].mxu1 }
 0x1e8   : > { %v3628_v20 = vpop.f32.mrb[3].mxu1  ;;  %v1116_v21 = vsel %vm1115_vm7, %v1111_v19, 0.0  ;;  %v1654_v19 = vld [vmem:[%s4722_s7 + $0x8] sm:$0xff] }
 0x1e9   : > { %1117 = vadd.xlane.f32.xlu0 %v1116_v21  ;;  %v1656_v20 = vld [vmem:[%s4722_s7 + $0x18] sm:$0xff]  ;;  %v1653_v21 = vld [vmem:[%s4722_s7] sm:$0xff] }
 0x216   : > { %1455 = vxpose.xlu0.b32.start [1/3] (short) (narrow) %v4256_v40, 8 }
 0x21a   : > { %1456 = vxpose.xlu0.b32.cont [2/3] (short) (narrow) %v4262_v41, 8 }
 0x21e   : > { %1457 = vxpose.xlu0.b32.end [3/3] (short) (narrow) %v4268_v42, 8 }
 0x247   : > { %3963 = vset.pattern.permute.xlu0 %v3996_v22  ;;  %v3874_v22 = vpack.c.bf16 %v1656_v20, %v1654_v19 }
 0x276   : > { %v1118_v24 = vpop.xlane.xlu0 %1117 }
 0x277   : > { %v1119_v25 = vmul.f32 %v1118_v24, %v4229_v23  ;;  %v1655_v24 = vld [vmem:[%s4722_s7 + $0x10] sm:$0xff] }
 0x279   : > { %3630 = vmatpush3.msk.msra.mxu1 %vm931_vm3, %v1119_v25  ;;  %v1658_v25 = vld [vmem:[%s4722_s7 + $0x28] sm:$0xff] }
 0x27a   : > { %3632 = vmatmul.mubr.msk.f32.vlgmr.msra.gmra.mrb[4].mxu1 %vm927_vm4, %v4189_v8  ;;  %3639 = vmatprep.subr.mxu1 %v3995_v7 }
 0x27b   : > { %3641 = vmatprep.mubr.msk.f32.mxu1 %vm3994_vm1, %v3995_v7 }
 0x296   : > { %v4325_v9 = vpop.trf.xlu0 }
 0x34d   : > { %v1189_v26 = vpop.f32.mrb[4].mxu1 }
 0x34e   : > { %1195 = vperm.xlu1 %3962, %v1189_v26   ;;  %v3633_v27 = vpop.f32.mrb[5].mxu1  ;;  %v1660_v26 = vld [vmem:[%s4722_s7 + $0x38] sm:$0xff] }
 0x34f   : > { %v3876_v27 = vpack.c.bf16 %v1655_v24, %v1653_v21 }
 0x3cd   : > { %v1196_v28 = vpop.permute.xlu1 %1195 }
 0x3ce   : > { %v1198_v29 = vsub.f32 %v4206_v15, %v1196_v28  ;;  %v3878_v28 = vpack.c.bf16 %v1660_v26, %v1658_v25 }
 0x3d0   : > { %v1199_v30 = vmul.f32 %v1198_v29, %v1198_v29 }
 0x3d2   : > { %3635 = vmatpush3.msk.msra.mxu0 %vm1041_vm5, %v1199_v30  ;;  %v1659_v30 = vld [vmem:[%s4722_s7 + $0x30] sm:$0xff] }
 0x3d3   : > { %3637 = vmatmul.mubr.msk.f32.vlgmr.msra.gmra.mrb[2].mxu0 %vm1037_vm6, %v4212_v16  ;;  %3644 = vmatprep.subr.mxu0 %v3995_v7 }
 0x3d4   : > { %3646 = vmatprep.mubr.msk.f32.mxu0 %vm3994_vm1, %v3995_v7 }
 0x4a6   : > { %v1269_v31 = vpop.f32.mrb[2].mxu0 }
 0x4a7   : > { %v3638_v32 = vpop.f32.mrb[3].mxu0  ;;  %v1273_v33 = vsel %vm1115_vm7, %v1269_v31, 0.0  ;;  %v1662_v31 = vld [vmem:[%s4722_s7 + $0x48] sm:$0xff] }
 0x4a8   : > { %1274 = vadd.xlane.f32.xlu1 %v1273_v33  ;;  %v1664_v32 = vld [vmem:[%s4722_s7 + $0x58] sm:$0xff] }
 0x535   : > { %v1275_v34 = vpop.xlane.xlu1 %1274 }
 0x536   : > { %v1276_v35 = vmul.f32 %v1275_v34, %v4229_v23  ;;  %v3882_v34 = vpack.c.bf16 %v1664_v32, %v1662_v31 }
 0x538   : > { %3640 = vmatpush3.msk.msra.mxu1 %vm931_vm3, %v1276_v35  ;;  %v1661_v35 = vld [vmem:[%s4722_s7 + $0x40] sm:$0xff] }
 0x539   : > { %3642 = vmatmul.mubr.msk.f32.vlgmr.msra.gmra.mrb[6].mxu1 %vm927_vm4, %v4189_v8  ;;  %3865 = vmatprep.subr.bf16.mxu1 %v3993_v4 }
 0x53a   : > { %3661 = vmatprep.mubr.msk.f32.mxu1 %vm3994_vm1, %v3995_v7 }
 0x60c   : > { %v1346_v36 = vpop.f32.mrb[6].mxu1 }
 0x60d   : > { %v1347_v37 = vadd.f32 1e-05, %v1346_v36  ;;  %v3643_v38 = vpop.f32.mrb[7].mxu1  ;;  %v1663_v36 = vld [vmem:[%s4722_s7 + $0x50] sm:$0xff] }
 0x60e   : > { %v1668_v38 = vld [vmem:[%s4722_s7 + $0x78] sm:$0xff] }
 0x60f   : > { %3964 = vrsqrt.f32 %v1347_v37  ;;  %v1666_v37 = vld [vmem:[%s4722_s7 + $0x68] sm:$0xff] }
 0x619   : > { %v3965_v39 = vpop.eup %3964 }
 0x61a   : > { %1353 = vperm.xlu1 %3962, %v3965_v39   ;;  %v3884_v39 = vpack.c.bf16 %v1663_v36, %v1661_v35 }
 0x699   : > { %v1354_v43 = vpop.permute.xlu1 %1353 }
 0x69a   : > { %v4271_v44 = vmul.f32 %v1354_v43, %v1198_v29  ;;  %v1657_v29 = vld [vmem:[%s4722_s7 + $0x20] sm:$0xff]  ;;  %v3886_v43 = vpack.c.bf16 %v1668_v38, %v1666_v37 }
 0x69b   : > { %v3880_v33 = vpack.c.bf16 %v1659_v30, %v1657_v29 }
 0x69c   : > { %3645 = vmatpush3.msk.msra.mxu0 %vm1041_vm5, %v4271_v44 }
 0x69d   : > { %3647 = vmatmul.mubr.msk.f32.vlgmr.msra.gmra.mrb[4].mxu0 %vm1037_vm6, %v4276_v45  ;;  %3868 = vmatprep.subr.bf16.mxu0 %v3993_v4 }
 0x69e   : > { %3649 = vmatprep.mubr.msk.f32.mxu0 %vm3994_vm1, %v3995_v7  ;;  %3870 = vmatpush3.bf16.msra.mxu0 %v3869_v50  ;;  %v3888_v50 = vpack.c.bf16 %v1667_v49, %v1665_v48 }
 0x69f   : > { %3871 = vmatprep.subr.bf16.mxu0 %v3993_v4 }
 0x6a1   : > { %3650 = vmatmul.mubr.msk.f32.gmra.mrb[6].mxu0 %vm1037_vm6, %v4288_v46 }
 0x6a2   : > { %3652 = vmatprep.mubr.msk.f32.mxu0 %vm3994_vm1, %v3995_v7  ;;  %3873 = vmatpush3.bf16.msra.mxu0 %v3872_v12 }
 0x6a3   : > { %3890 = vmatprep.subr.bf16.mxu0 %v3993_v4 }
 0x6a5   : > { %3653 = vmatmul.mubr.msk.f32.gmra.mrb[8].mxu0 %vm1037_vm6, %v4297_v47 }
 0x6a6   : > { %3672 = vmatprep.mubr.msk.f32.mxu0 %vm3994_vm1, %v3995_v7 }
 0x770   : > { %v1435_v52 = vpop.f32.mrb[4].mxu0 }
 0x771   : > { %v1436_v53 = vadd.f32 %v1435_v52, %v4309_v51  ;;  %v3648_v54 = vpop.f32.mrb[5].mxu0  ;;  %v1756_v52 = vld [vmem:[%s4140_s3] sm:$0xff] }
 0x772   : > { %v1758_v54 = vld [vmem:[%s4140_s3 + $0x10] sm:$0xff] }
 0x773   : > { %v1449_v57 = vmax.f32 %v1436_v53, 0.0  ;;  %v1757_v53 = vld [vmem:[%s4140_s3 + $0x8] sm:$0xff] }
 0x774   : > { %v1440_v56 = vpop.f32.mrb[6].mxu0 }
 0x775   : > { %v1441_v58 = vadd.f32 %v1440_v56, %v4315_v55  ;;  %v3651_v59 = vpop.f32.mrb[7].mxu0  ;;  %v1452_v63 = vadd.f32 1e-07, %v1449_v57  ;;  %v3891_v56 = vpack.c.bf16 %v1757_v53, %v1756_v52  ;;  %v1759_v57 = vld [vmem:[%s4140_s3 + $0x18] sm:$0xff]  ;;  %s3997_s3 = smov 32  }
 0x776   : > { %v3448_v59 = vld [vmem:[%s4724_s29] ss:$0 sm:$0xff] }
 0x777   : > { %v1450_v61 = vmax.f32 %v1441_v58, 0.0  ;;  %v3894_v58 = vpack.c.bf16 %v1759_v57, %v1758_v54 }
 0x778   : > { %v1445_v62 = vpop.f32.mrb[8].mxu0 }
 0x779   : > { %v1453_v0 = vadd.f32 1e-07, %v1450_v61  ;;  %v1446_v1 = vadd.f32 %v1445_v62, %v4321_v60  ;;  %v3654_v2 = vpop.f32.mrb[9].mxu0 }
 0x77b   : > { %v3866_v3 = vpack.c.bf16 %v1453_v0, %v1452_v63  ;;  %v1451_v5 = vmax.f32 %v1446_v1, 0.0 }
 0x77d   : > { %v1454_v6 = vadd.f32 1e-07, %v1451_v5  ;;  %3867 = vmatpush3.bf16.msra.mxu1 %v3866_v3  ;;  %v1669_v3 = vld [vmem:[%s4135_s6] sm:$0x3]  ;;  %s3999_s6 = smov 96  }
 0x77e   : > { %3659 = vmatprep.subr.mxu1 %v3995_v7 }
 0x781   : > { %3660 = vmatpush3.msk.msra.mxu1 %vm1041_vm5, %v1454_v6 }
 0x782   : > { %3662 = vmatmul.mubr.msk.f32.vlgmr.msra.gmra.mrb[8].mxu1 %vm1487_vm8, %v4325_v9  ;;  %3875 = vmatprep.subr.bf16.mxu1 %v3874_v22 }
 0x783   : > { %1749 = vmatprep.mubr.f32.mxu1 %v3995_v7  ;;  %3877 = vmatpush1.bf16.msra.mxu1 %v3876_v27 }
 0x784   : > { %3879 = vmatprep.subr.bf16.mxu1 %v3878_v28 }
 0x787   : > { %3881 = vmatpush1.bf16.msra.mxu1 %v3880_v33 }
 0x788   : > { %3883 = vmatprep.subr.bf16.mxu1 %v3882_v34 }
 0x78b   : > { %3885 = vmatpush1.bf16.msra.mxu1 %v3884_v39 }
 0x78c   : > { %3887 = vmatprep.subr.bf16.mxu1 %v3886_v43 }
 0x78f   : > { %3889 = vmatpush1.bf16.msra.mxu1 %v3888_v50 }
 0x790   : > { %3714 = vmatprep.subr.mxu1 %v3995_v7 }
 0x855   : > { %v1560_v13 = vpop.f32.mrb[8].mxu1 }
 0x856   : > { %v1561_v14 = vadd.f32 %v1560_v13, %v4271_v44  ;;  %v3663_v18 = vpop.f32.mrb[9].mxu1 }
 0x858   : > { %3673 = vmatmul.mubr.msk.f32.vlgmr.msra.gmra.mrb[10].mxu0 %vm853_vm2, %v1561_v14 }
 0x859   : > { %3683 = vmatprep.mubr.msk.f32.mxu0 %vm3994_vm1, %v3995_v7  ;;  %3892 = vmatpush3.bf16.msra.mxu0 %v3891_v56 }
 0x85a   : > { %3893 = vmatprep.subr.bf16.mxu0 %v3993_v4 }
 0x85d   : > { %3895 = vmatpush3.bf16.msra.mxu0 %v3894_v58 }
 0x85e   : > { %3692 = vmatprep.subr.mxu0 %v3995_v7 }
 0x860   : > { %3684 = vmatmul.mubr.msk.f32.vlgmr.msra.gmra.mrb[12].mxu0 %vm853_vm2, %v4309_v51 }
 0x861   : > { %3686 = vmatprep.mubr.msk.f32.mxu0 %vm3994_vm1, %v3995_v7 }
 0x864   : > { %3687 = vmatmul.mubr.msk.f32.gmra.mrb[14].mxu0 %vm853_vm2, %v4315_v55  ;;  %v1671_v55 = vlaneseq }
 0x865   : > { %3689 = vmatprep.mubr.msk.f32.mxu0 %vm3994_vm1, %v3995_v7 }
 0x866   : > { %v1672_v1 = vshrl.u32 %v1671_v55, 7 }
 0x868   : > { %3690 = vmatmul.mubr.msk.f32.gmra.mrb[16].mxu0 %vm853_vm2, %v4321_v60  ;;  %v1673_v2 = vsub.s32 0, %v1672_v1  ;;  %v1677_v5 = vsub.s32 1, %v1672_v1 }
 0x869   : > { %3694 = vmatprep.mubr.msk.f32.mxu0 %vm3994_vm1, %v3995_v7 }
 0x86a   : > { %v1674_v6 = vrot.slane %v1669_v3, %v1673_v2  ;;  %v1678_v60 = vrot.slane %v1669_v3, %v1677_v5 }
 0x92b   : > { %v1644_v61 = vpop.f32.mrb[10].mxu0 }
 0x92c   : > { %v1645_v62 = vadd.f32 %v3448_v59, %v1644_v61  ;;  %v3674_v63 = vpop.f32.mrb[11].mxu0 }
 0x92e   : > { %1649 = vrot.lane.b32.xlu1 %v1645_v62, %s3997_s3 }
 0x933   : > { %v1835_v10 = vpop.f32.mrb[12].mxu0 }
 0x934   : > { %v3685_v12 = vpop.f32.mrb[13].mxu0 }
 0x9a0   : > { %v1650_v51 = vpop.permute.xlu1 %1649 }
 0x9a1   : > { %v1652_v0 = vsel %vm853_vm2, %v4271_v44, %v1650_v51  ;;  %v1840_v44 = vpop.f32.mrb[14].mxu0 }
 0x9a2   : > { %3450 = vmatmul.mubr.msk.f32.vlgmr.msra.gmra.mrb[10].mxu1 %vm1681_vm9, %v1652_v0  ;;  %v3688_v19 = vpop.f32.mrb[15].mxu0 }
 0x9a3   : > { %3716 = vmatprep.mubr.msk.f32.mxu1 %vm3994_vm1, %v3995_v7  ;;  %v1845_v20 = vpop.f32.mrb[16].mxu0 }
 0x9a4   : > { %v3691_v21 = vpop.f32.mrb[17].mxu0 }
 0xa75   : > { %v1751_v11 = vpop.f32.mrb[10].mxu1 }
 0xa76   : > { %v1752_v13 = vadd.f32 %v1751_v11, %v1674_v6  ;;  %v1753_v14 = vpop.f32.mrb[11].mxu1 }
 0xa77   : > { %v4384_v18 = vadd.f32 %v1753_v14, %v1678_v60 }
 0xa78   : > { %1941 = vrot.lane.b32.xlu1 %v1752_v13, %s3998_s9  ;;  %3693 = vmatpush3.msk.msra.mxu0 %vm1041_vm5, %v1752_v13 }
 0xa79   : > { %3715 = vmatpush3.msk.msra.mxu1 %vm1041_vm5, %v4384_v18  ;;  %3695 = vmatmul.mubr.msk.f32.vlgmr.msra.gmra.mrb[18].mxu0 %vm1037_vm6, %v4256_v40 }
 0xa7a   : > { %3717 = vmatmul.mubr.msk.f32.vlgmr.msra.gmra.mrb[12].mxu1 %vm1037_vm6, %v4276_v45  ;;  %3697 = vmatprep.mubr.msk.f32.mxu0 %vm3994_vm1, %v3995_v7 }
 0xa7b   : > { %3719 = vmatprep.mubr.msk.f32.mxu1 %vm3994_vm1, %v3995_v7  ;;  %3703 = vmatprep.subr.mxu0 %v3995_v7 }
 0xa7c   : > { %3899 = vmatprep.subr.bf16.mxu1 %v3993_v4 }
 0xa7d   : > { %3698 = vmatmul.mubr.msk.f32.gmra.mrb[20].mxu0 %vm1037_vm6, %v4262_v41 }
 0xa7e   : > { %3720 = vmatmul.mubr.msk.f32.gmra.mrb[14].mxu1 %vm1037_vm6, %v4288_v46  ;;  %3700 = vmatprep.mubr.msk.f32.mxu0 %vm3994_vm1, %v3995_v7 }
 0xa7f   : > { %3722 = vmatprep.mubr.msk.f32.mxu1 %vm3994_vm1, %v3995_v7 }
 0xa81   : > { %3701 = vmatmul.mubr.msk.f32.gmra.mrb[22].mxu0 %vm1037_vm6, %v4268_v42 }
 0xa82   : > { %3723 = vmatmul.mubr.msk.f32.gmra.mrb[16].mxu1 %vm1037_vm6, %v4297_v47  ;;  %3705 = vmatprep.mubr.msk.f32.mxu0 %vm3994_vm1, %v3995_v7 }
 0xa83   : > { %3751 = vmatprep.mubr.msk.f32.mxu1 %vm3994_vm1, %v3995_v7 }
 0xaea   : > { %v1942_v22 = vpop.permute.xlu1 %1941 }
 0xaeb   : > { %3704 = vmatpush3.msk.msra.mxu0 %vm1041_vm5, %v1942_v22 }
 0xaec   : > { %3706 = vmatmul.mubr.msk.f32.vlgmr.msra.gmra.mrb[24].mxu0 %vm1037_vm6, %v4276_v45  ;;  %3896 = vmatprep.subr.bf16.mxu0 %v3993_v4 }
 0xaed   : > { %3708 = vmatprep.mubr.msk.f32.mxu0 %vm3994_vm1, %v3995_v7 }
 0xaf0   : > { %3709 = vmatmul.mubr.msk.f32.gmra.mrb[26].mxu0 %vm1037_vm6, %v4288_v46 }
 0xaf1   : > { %3711 = vmatprep.mubr.msk.f32.mxu0 %vm3994_vm1, %v3995_v7 }
 0xaf4   : > { %3712 = vmatmul.mubr.msk.f32.gmra.mrb[28].mxu0 %vm1037_vm6, %v4297_v47 }
 0xaf5   : > { %3731 = vmatprep.mubr.msk.f32.mxu0 %vm3994_vm1, %v3995_v7 }
 0xb4c   : > { %v1927_v24 = vpop.f32.mrb[18].mxu0 }
 0xb4d   : > { %v2094_v25 = vpop.f32.mrb[12].mxu1  ;;  %v3696_v45 = vpop.f32.mrb[19].mxu0 }
 0xb4e   : > { %v4430_v26 = vadd.f32 %v2094_v25, %v1835_v10  ;;  %v3718_v27 = vpop.f32.mrb[13].mxu1 }
 0xb50   : > { %v1932_v28 = vpop.f32.mrb[20].mxu0 }
 0xb51   : > { %v2099_v29 = vpop.f32.mrb[14].mxu1  ;;  %v3699_v30 = vpop.f32.mrb[21].mxu0 }
 0xb52   : > { %v4432_v31 = vadd.f32 %v2099_v29, %v1840_v44  ;;  %v3721_v46 = vpop.f32.mrb[15].mxu1 }
 0xb54   : > { %v1937_v32 = vpop.f32.mrb[22].mxu0 }
 0xb55   : > { %v2104_v33 = vpop.f32.mrb[16].mxu1  ;;  %v3702_v34 = vpop.f32.mrb[23].mxu0 }
 0xb56   : > { %v4434_v35 = vadd.f32 %v2104_v33, %v1845_v20  ;;  %v3724_v47 = vpop.f32.mrb[17].mxu1 }
 0xbbf   : > { %v2011_v36 = vpop.f32.mrb[24].mxu0 }
 0xbc0   : > { %v2012_v37 = vadd.f32 %v2011_v36, %v1835_v10  ;;  %v3707_v38 = vpop.f32.mrb[25].mxu0 }
 0xbc2   : > { %v2111_v39 = vmul.f32 %v2012_v37, %v1927_v24 }
 0xbc3   : > { %v2016_v43 = vpop.f32.mrb[26].mxu0 }
 0xbc4   : > { %v2017_v48 = vadd.f32 %v2016_v43, %v1840_v44  ;;  %2346 = vrot.lane.b32.xlu1 %v2111_v39, %s3999_s6  ;;  %v3710_v49 = vpop.f32.mrb[27].mxu0  ;;  %v2114_v58 = vsel %vm853_vm2, %v2111_v39, 0.0 }
 0xbc6   : > { %v2112_v50 = vmul.f32 %v2017_v48, %v1932_v28 }
 0xbc7   : > { %v2021_v52 = vpop.f32.mrb[28].mxu0 }
 0xbc8   : > { %v2022_v53 = vadd.f32 %v2021_v52, %v1845_v20  ;;  %2348 = vrot.lane.b32.xlu1 %v2112_v50, %s3999_s6  ;;  %v2117_v54 = vsel %vm853_vm2, %v2112_v50, 0.0  ;;  %v3713_v56 = vpop.f32.mrb[29].mxu0 }
 0xbc9   : > { %2118 = vadd.xlane.f32.xlu0 %v2117_v54 }
 0xbca   : > { %v2113_v57 = vmul.f32 %v2022_v53, %v1937_v32 }
 0xbcc   : > { %2350 = vrot.lane.b32.xlu1 %v2113_v57, %s3999_s6  ;;  %v2121_v59 = vsel %vm2120_vm10, %v2113_v57, 0.0 }
 0xbf0   : > { %2115 = vadd.xlane.f32.xlu1 %v2114_v58 }
 0xbf4   : > { %2122 = vadd.xlane.f32.xlu1 %v2121_v59 }
 0xc36   : > { %v2347_v61 = vpop.permute.xlu1 %2346 }
 0xc37   : > { %v2355_v62 = vsel %vm853_vm2, %v2347_v61, 0.0 }
 0xc38   : > { %2356 = vadd.xlane.f32.xlu1 %v2355_v62 }
 0xc3a   : > { %v2349_v63 = vpop.permute.xlu1 %2348 }
 0xc3b   : > { %v2358_v51 = vsel %vm853_vm2, %v2349_v63, 0.0 }
 0xc3c   : > { %2359 = vadd.xlane.f32.xlu1 %v2358_v51 }
 0xc3e   : > { %v2351_v0 = vpop.permute.xlu1 %2350 }
 0xc3f   : > { %v2361_v55 = vsel %vm2120_vm10, %v2351_v0, 0.0 }
 0xc40   : > { %2362 = vadd.xlane.f32.xlu1 %v2361_v55 }
 0xc56   : > { %v2119_v1 = vpop.xlane.xlu0 %2118 }
 0xc57   : > { %v4445_v2 = vmul.f32 0.17677669, %v2119_v1 }
 0xc59   : > { %v2128_v6 = vsel %vm2109_vm11, %v4445_v2, -1e+30 }
 0xc5a   : > { %v2131_v13 = vsel %vm1037_vm6, %v2128_v6, -inf }
 0xc7d   : > { %v2116_v3 = vpop.xlane.xlu1 %2115 }
 0xc7e   : > { %v2124_v5 = vmul.f32 0.17677669, %v2116_v3 }
 0xc80   : > { %v2127_v60 = vsel %vm2108_vm12, %v2124_v5, -1e+30 }
 0xc81   : > { %v2130_v10 = vsel %vm1037_vm6, %v2127_v60, -inf  ;;  %v2123_v11 = vpop.xlane.xlu1 %2122 }
 0xc82   : > { %v4456_v12 = vmul.f32 0.17677669, %v2123_v11  ;;  %v2134_v14 = vmax.f32 %v2130_v10, %v2131_v13 }
 0xc84   : > { %v2129_v44 = vsel %vm2110_vm13, %v4456_v12, -1e+30 }
 0xc85   : > { %v2133_v19 = vsel %vm2132_vm14, %v2129_v44, -inf }
 0xc86   : > { %v2135_v20 = vmax.f32 %v2134_v14, %v2133_v19 }
 0xc88   : > { %v2136_v21 = vrot.slane %v2135_v20, 4 }
 0xc8a   : > { %v2137_v22 = vmax.f32 %v2135_v20, %v2136_v21 }
 0xc8c   : > { %v2138_v24 = vrot.slane %v2137_v22, 2 }
 0xc8e   : > { %v2139_v25 = vmax.f32 %v2137_v22, %v2138_v24 }
 0xc90   : > { %v2140_v45 = vrot.slane %v2139_v25, 1 }
 0xc92   : > { %v2141_v27 = vmax.f32 %v2139_v25, %v2140_v45 }
 0xc94   : > { %v2142_v28 = vmul.f32 %v2141_v27, %v4256_v40  ;;  %v2143_v30 = vmul.f32 %v2141_v27, %v4262_v41  ;;  %v2144_v3 = vmul.f32 %v2141_v27, %v4268_v42 }
 0xc96   : > { %v2145_v29 = vsel %vm1037_vm6, %v2142_v28, 0.0  ;;  %v2148_v46 = vsel %vm1037_vm6, %v2143_v30, 0.0  ;;  %v2151_v6 = vsel %vm2132_vm14, %v2144_v3, 0.0 }
 0xc97   : > { %2146 = vadd.xlane.f32.xlu1 %v2145_v29 }
 0xc9b   : > { %2149 = vadd.xlane.f32.xlu1 %v2148_v46 }
 0xcc5   : > { %v2357_v32 = vpop.xlane.xlu1 %2356 }
 0xcc6   : > { %v2364_v33 = vmul.f32 0.17677669, %v2357_v32 }
 0xcc8   : > { %v2367_v36 = vsel %vm2108_vm12, %v2364_v33, -1e+30 }
 0xcc9   : > { %v2360_v34 = vpop.xlane.xlu1 %2359  ;;  %v2370_v48 = vsel %vm1037_vm6, %v2367_v36, -inf }
 0xcca   : > { %v2365_v47 = vmul.f32 0.17677669, %v2360_v34 }
 0xccc   : > { %v2368_v37 = vsel %vm2109_vm11, %v2365_v47, -1e+30 }
 0xccd   : > { %v2371_v38 = vsel %vm1037_vm6, %v2368_v37, -inf  ;;  %v2363_v39 = vpop.xlane.xlu1 %2362 }
 0xcce   : > { %v2366_v43 = vmul.f32 0.17677669, %v2363_v39  ;;  %v2373_v49 = vmax.f32 %v2370_v48, %v2371_v38 }
 0xcd0   : > { %v2369_v50 = vsel %vm2110_vm13, %v2366_v43, -1e+30 }
 0xcd1   : > { %v2372_v52 = vsel %vm2132_vm14, %v2369_v50, -inf }
 0xcd2   : > { %v2374_v53 = vmax.f32 %v2373_v49, %v2372_v52 }
 0xcd4   : > { %v2375_v54 = vrot.slane %v2374_v53, 4 }
 0xcd6   : > { %v2376_v56 = vmax.f32 %v2374_v53, %v2375_v54 }
 0xcd8   : > { %v2377_v57 = vrot.slane %v2376_v56, 2 }
 0xcda   : > { %v2378_v58 = vmax.f32 %v2376_v56, %v2377_v57 }
 0xcdc   : > { %v2379_v59 = vrot.slane %v2378_v58, 1 }
 0xcde   : > { %v2380_v61 = vmax.f32 %v2378_v58, %v2379_v59 }
 0xce0   : > { %v2383_v62 = vmul.f32 %v2380_v61, %v4268_v42  ;;  %v2381_v63 = vmul.f32 %v2380_v61, %v4256_v40  ;;  %v2382_v55 = vmul.f32 %v2380_v61, %v4262_v41 }
 0xce2   : > { %v2390_v51 = vsel %vm2132_vm14, %v2383_v62, 0.0  ;;  %v2384_v0 = vsel %vm1037_vm6, %v2381_v63, 0.0  ;;  %v2387_v1 = vsel %vm1037_vm6, %v2382_v55, 0.0 }
 0xce3   : > { %2391 = vadd.xlane.f32.xlu0 %v2390_v51  ;;  %2385 = vadd.xlane.f32.xlu1 %v2384_v0 }
 0xce7   : > { %2388 = vadd.xlane.f32.xlu1 %v2387_v1 }
 0xceb   : > { %2152 = vadd.xlane.f32.xlu1 %v2151_v6 }
 0xd24   : > { %v2147_v60 = vpop.xlane.xlu1 %2146 }
 0xd25   : > { %v2154_v10 = vsub.f32 %v2124_v5, %v2147_v60  ;;  %v2661_v60 = vld [vmem:[%s4150_s30] sm:$0xff] }
 0xd27   : > { %v2157_v11 = vmul.f32 1.442695, %v2154_v10  ;;  %v2662_v10 = vld [vmem:[%s4150_s30 + $0x8] sm:$0xff] }
 0xd28   : > { %v2150_v13 = vpop.xlane.xlu1 %2149 }
 0xd29   : > { %v2155_v14 = vsub.f32 %v4445_v2, %v2150_v13  ;;  %3966 = vpow2.f32 %v2157_v11  ;;  %v2663_v11 = vld [vmem:[%s4150_s30 + $0x10] sm:$0xff]  ;;  %v3906_v13 = vpack.c.bf16 %v2662_v10, %v2661_v60 }
 0xd2b   : > { %v2159_v44 = vmul.f32 1.442695, %v2155_v14  ;;  %v2664_v14 = vld [vmem:[%s4150_s30 + $0x18] sm:$0xff] }
 0xd2d   : > { %3968 = vpow2.f32 %v2159_v44  ;;  %v3909_v44 = vpack.c.bf16 %v2664_v14, %v2663_v11  ;;  %v3158_v14 = vld [vmem:[%s4164_s11 + $0x8] sm:$0xff] }
 0xd33   : > { %v4485_v19 = vpop.eup %3966 }
 0xd37   : > { %v4487_v20 = vpop.eup %3968 }
 0xd38   : > { %v3897_v21 = vpack.c.bf16 %v4487_v20, %v4485_v19 }
 0xd3a   : > { %3898 = vmatpush3.bf16.msra.mxu0 %v3897_v21 }
 0xd3b   : > { %3729 = vmatprep.subr.mxu0 %v3995_v7 }
 0xd70   : > { %v2386_v22 = vpop.xlane.xlu1 %2385  ;;  %v2392_v5 = vpop.xlane.xlu0 %2391 }
 0xd71   : > { %v2393_v24 = vsub.f32 %v2364_v33, %v2386_v22  ;;  %v2395_v2 = vsub.f32 %v2366_v43, %v2392_v5 }
 0xd73   : > { %v2396_v25 = vmul.f32 1.442695, %v2393_v24  ;;  %v2400_v46 = vmul.f32 1.442695, %v2395_v2 }
 0xd74   : > { %v2389_v45 = vpop.xlane.xlu1 %2388 }
 0xd75   : > { %v2394_v27 = vsub.f32 %v2365_v47, %v2389_v45  ;;  %3970 = vpow2.f32 %v2396_v25 }
 0xd77   : > { %v2398_v28 = vmul.f32 1.442695, %v2394_v27 }
 0xd78   : > { %v2153_v29 = vpop.xlane.xlu1 %2152 }
 0xd79   : > { %3972 = vpow2.f32 %v2398_v28  ;;  %v2156_v30 = vsub.f32 %v4456_v12, %v2153_v29 }
 0xd7b   : > { %v2161_v32 = vmul.f32 1.442695, %v2156_v30 }
 0xd7d   : > { %3974 = vpow2.f32 %v2161_v32 }
 0xd7e   : > { %3976 = vpow2.f32 %v2400_v46 }
 0xd7f   : > { %v3971_v34 = vpop.eup %3970 }
 0xd83   : > { %v3973_v36 = vpop.eup %3972 }
 0xd84   : > { %v3900_v37 = vpack.c.bf16 %v3973_v36, %v3971_v34 }
 0xd86   : > { %3901 = vmatpush3.bf16.msra.mxu1 %v3900_v37  ;;  %v2668_v37 = vld [vmem:[%s4150_s30 + $0x38] sm:$0xff] }
 0xd87   : > { %v3975_v33 = vpop.eup %3974  ;;  %3749 = vmatprep.subr.mxu1 %v3995_v7 }
 0xd88   : > { %3730 = vmatpush3.msk.msra.mxu0 %vm1041_vm5, %v3975_v33  ;;  %v3977_v47 = vpop.eup %3976 }
 0xd89   : > { %3732 = vmatmul.mubr.msk.f32.vlgmr.msra.gmra.mrb[30].mxu0 %vm1487_vm8, %v4325_v9  ;;  %3734 = vmatprep.subr.mxu0 %v3995_v7 }
 0xd8a   : > { %3750 = vmatpush3.msk.msra.mxu1 %vm1041_vm5, %v3977_v47  ;;  %3736 = vmatprep.mubr.msk.f32.mxu0 %vm3994_vm1, %v3995_v7 }
 0xd8b   : > { %3752 = vmatmul.mubr.msk.f32.vlgmr.msra.gmra.mrb[18].mxu1 %vm1487_vm8, %v4325_v9  ;;  %3754 = vmatprep.subr.mxu1 %v3995_v7 }
 0xd8c   : > { %3756 = vmatprep.mubr.msk.f32.mxu1 %vm3994_vm1, %v3995_v7 }
 0xe5c   : > { %v2232_v12 = vpop.f32.mrb[30].mxu0 }
 0xe5d   : > { %v2236_v38 = vmax.f32 %v2232_v12, 1e-30  ;;  %v3733_v39 = vpop.f32.mrb[31].mxu0 }
 0xe5e   : > { %v2471_v43 = vpop.f32.mrb[18].mxu1 }
 0xe5f   : > { %3978 = vrcp.f32 %v2236_v38  ;;  %v2475_v48 = vmax.f32 %v2471_v43, 1e-30  ;;  %v3753_v49 = vpop.f32.mrb[19].mxu1 }
 0xe61   : > { %3980 = vrcp.f32 %v2475_v48 }
 0xe69   : > { %v3979_v50 = vpop.eup %3978 }
 0xe6a   : > { %3735 = vmatpush3.msk.msra.mxu0 %vm1041_vm5, %v3979_v50 }
 0xe6b   : > { %v3981_v52 = vpop.eup %3980  ;;  %3737 = vmatmul.mubr.msk.f32.vlgmr.msra.gmra.mrb[32].mxu0 %vm1037_vm6, %v4256_v40  ;;  %3902 = vmatprep.subr.bf16.mxu0 %v3993_v4 }
 0xe6c   : > { %3755 = vmatpush3.msk.msra.mxu1 %vm1041_vm5, %v3981_v52  ;;  %3739 = vmatprep.mubr.msk.f32.mxu0 %vm3994_vm1, %v3995_v7 }
 0xe6d   : > { %3757 = vmatmul.mubr.msk.f32.vlgmr.msra.gmra.mrb[20].mxu1 %vm1037_vm6, %v4256_v40  ;;  %3905 = vmatprep.subr.bf16.mxu1 %v3993_v4 }
 0xe6e   : > { %3759 = vmatprep.mubr.msk.f32.mxu1 %vm3994_vm1, %v3995_v7  ;;  %3907 = vmatpush3.bf16.msra.mxu1 %v3906_v13  ;;  %v3157_v13 = vld [vmem:[%s4164_s11] sm:$0xff] }
 0xe6f   : > { %3740 = vmatmul.mubr.msk.f32.gmra.mrb[34].mxu0 %vm1037_vm6, %v4262_v41  ;;  %3908 = vmatprep.subr.bf16.mxu1 %v3993_v4 }
 0xe70   : > { %3742 = vmatprep.mubr.msk.f32.mxu0 %vm3994_vm1, %v3995_v7 }
 0xe71   : > { %3760 = vmatmul.mubr.msk.f32.gmra.mrb[22].mxu1 %vm1037_vm6, %v4262_v41 }
 0xe72   : > { %3762 = vmatprep.mubr.msk.f32.mxu1 %vm3994_vm1, %v3995_v7  ;;  %3910 = vmatpush3.bf16.msra.mxu1 %v3909_v44  ;;  %v3159_v44 = vld [vmem:[%s4164_s11 + $0x10] sm:$0xff] }
 0xe73   : > { %3743 = vmatmul.mubr.msk.f32.gmra.mrb[36].mxu0 %vm1037_vm6, %v4268_v42  ;;  %3911 = vmatprep.subr.bf16.mxu1 %v3993_v4 }
 0xe74   : > { %3771 = vmatprep.mubr.msk.f32.mxu0 %vm3994_vm1, %v3995_v7 }
 0xe75   : > { %3763 = vmatmul.mubr.msk.f32.gmra.mrb[24].mxu1 %vm1037_vm6, %v4268_v42 }
 0xe76   : > { %3790 = vmatprep.mubr.msk.f32.mxu1 %vm3994_vm1, %v3995_v7 }
 0xf3e   : > { %v2308_v40 = vpop.f32.mrb[32].mxu0 }
 0xf3f   : > { %v2322_v53 = vmul.f32 %v4485_v19, %v2308_v40  ;;  %v3738_v54 = vpop.f32.mrb[33].mxu0  ;;  %v2665_v19 = vld [vmem:[%s4150_s30 + $0x20] sm:$0xff] }
 0xf40   : > { %v2547_v41 = vpop.f32.mrb[20].mxu1 }
 0xf41   : > { %2327 = vperm.xlu1 %3962, %v2322_v53   ;;  %v3758_v56 = vpop.f32.mrb[21].mxu1  ;;  %v2561_v58 = vmul.f32 %v3971_v34, %v2547_v41 }
 0xf42   : > { %v2313_v57 = vpop.f32.mrb[34].mxu0 }
 0xf43   : > { %v2323_v59 = vmul.f32 %v4487_v20, %v2313_v57  ;;  %v3741_v61 = vpop.f32.mrb[35].mxu0  ;;  %v2666_v20 = vld [vmem:[%s4150_s30 + $0x28] sm:$0xff] }
 0xf44   : > { %v2552_v62 = vpop.f32.mrb[22].mxu1  ;;  %v3912_v21 = vpack.c.bf16 %v2666_v20, %v2665_v19  ;;  %v3924_v19 = vpack.c.bf16 %v3158_v14, %v3157_v13  ;;  %v3160_v20 = vld [vmem:[%s4164_s11 + $0x18] sm:$0xff] }
 0xf45   : > { %2566 = vperm.xlu1 %3962, %v2561_v58   ;;  %2332 = vperm.xlu0 %3963, %v2323_v59   ;;  %v3761_v42 = vpop.f32.mrb[23].mxu1  ;;  %v2562_v51 = vmul.f32 %v3973_v36, %v2552_v62 }
 0xf46   : > { %v2318_v63 = vpop.f32.mrb[36].mxu0  ;;  %3913 = vmatpush3.bf16.msra.mxu1 %v3912_v21  ;;  %v3927_v21 = vpack.c.bf16 %v3160_v20, %v3159_v44 }
 0xf47   : > { %v3744_v0 = vpop.f32.mrb[37].mxu0  ;;  %v2324_v3 = vmul.f32 %v3975_v33, %v2318_v63  ;;  %3914 = vmatprep.subr.bf16.mxu1 %v3993_v4 }
 0xf48   : > { %v2557_v55 = vpop.f32.mrb[24].mxu1  ;;  %v3070_v0 = vld [vmem:[%s4155_s5] sm:$0xff] }
 0xf49   : > { %2571 = vperm.xlu1 %3962, %v2562_v51   ;;  %v3764_v1 = vpop.f32.mrb[25].mxu1  ;;  %v2563_v6 = vmul.f32 %v3977_v47, %v2557_v55  ;;  %v3071_v55 = vld [vmem:[%s4155_s5 + $0x8] sm:$0xff] }
 0xf4a   : > { %v3072_v1 = vld [vmem:[%s4155_s5 + $0x10] sm:$0xff] }
 0xf4d   : > { %2337 = vperm.xlu1 %3962, %v2324_v3   ;;  %v3073_v3 = vld [vmem:[%s4155_s5 + $0x18] sm:$0xff] }
 0xf51   : > { %2576 = vperm.xlu1 %3962, %v2563_v6   ;;  %v3921_v6 = vpack.c.bf16 %v3073_v3, %v3072_v1 }
 0xf55   : > { %2585 = vrot.lane.b32.xlu1 %v4384_v18, %s3998_s9 }
 0xf59   : > { %2752 = vrot.lane.b32.xlu1 %v4223_v17, %s3999_s6 }
 0xfc0   : > { %v2328_v18 = vpop.permute.xlu1 %2327 }
 0xfc1   : > { %v2340_v45 = vmul.f32 %v2328_v18, %v4430_v26  ;;  %v3161_v18 = vld [vmem:[%s4164_s11 + $0x20] sm:$0xff] }
 0xfc4   : > { %v2567_v22 = vpop.permute.xlu1 %2566  ;;  %v2333_v24 = vpop.permute.xlu0 %2332 }
 0xfc5   : > { %v2579_v5 = vmul.f32 %v2567_v22, %v4430_v26  ;;  %v2341_v27 = vmul.f32 %v2333_v24, %v4432_v31  ;;  %v3162_v22 = vld [vmem:[%s4164_s11 + $0x28] sm:$0xff] }
 0xfc6   : > { %v3930_v24 = vpack.c.bf16 %v3162_v22, %v3161_v18 }
 0xfc7   : > { %v2582_v28 = vsel %vm853_vm2, %v2340_v45, %v2579_v5  ;;  %v3163_v5 = vld [vmem:[%s4164_s11 + $0x30] sm:$0xff] }
 0xfc8   : > { %v2572_v25 = vpop.permute.xlu1 %2571 }
 0xfc9   : > { %v2580_v2 = vmul.f32 %v2572_v25, %v4432_v31  ;;  %v2667_v31 = vld [vmem:[%s4150_s30 + $0x30] sm:$0xff]  ;;  %v3164_v25 = vld [vmem:[%s4164_s11 + $0x38] sm:$0xff] }
 0xfca   : > { %v3915_v33 = vpack.c.bf16 %v2668_v37, %v2667_v31  ;;  %v3933_v45 = vpack.c.bf16 %v3164_v25, %v3163_v5  ;;  %v3171_v37 = vld [vmem:[%s4164_s11 + $0x70] sm:$0xff] }
 0xfcb   : > { %v2583_v29 = vsel %vm853_vm2, %v2341_v27, %v2580_v2  ;;  %v3165_v27 = vld [vmem:[%s4164_s11 + $0x40] sm:$0xff]  ;;  %v3166_v2 = vld [vmem:[%s4164_s11 + $0x48] sm:$0xff] }
 0xfcc   : > { %v3903_v30 = vpack.c.bf16 %v2583_v29, %v2582_v28  ;;  %v2338_v46 = vpop.permute.xlu1 %2337  ;;  %3916 = vmatpush3.bf16.msra.mxu1 %v3915_v33  ;;  %v3936_v28 = vpack.c.bf16 %v3166_v2, %v3165_v27  ;;  %v3167_v29 = vld [vmem:[%s4164_s11 + $0x50] sm:$0xff]  ;;  %v3172_v33 = vld [vmem:[%s4164_s11 + $0x78] sm:$0xff] }
 0xfcd   : > { %v2342_v34 = vmul.f32 %v2338_v46, %v4434_v35  ;;  %3808 = vmatprep.subr.mxu1 %v3995_v7 }
 0xfce   : > { %3904 = vmatpush3.bf16.msra.mxu0 %v3903_v30  ;;  %v3168_v30 = vld [vmem:[%s4164_s11 + $0x58] sm:$0xff] }
 0xfcf   : > { %3769 = vmatprep.subr.mxu0 %v3995_v7  ;;  %v3939_v46 = vpack.c.bf16 %v3168_v30, %v3167_v29 }
 0xfd0   : > { %v2577_v32 = vpop.permute.xlu1 %2576 }
 0xfd1   : > { %v2581_v26 = vmul.f32 %v2577_v32, %v4434_v35  ;;  %v3169_v32 = vld [vmem:[%s4164_s11 + $0x60] sm:$0xff] }
 0xfd3   : > { %v2584_v36 = vsel %vm853_vm2, %v2342_v34, %v2581_v26  ;;  %v3170_v34 = vld [vmem:[%s4164_s11 + $0x68] sm:$0xff] }
 0xfd4   : > { %3770 = vmatpush3.msk.msra.mxu0 %vm1041_vm5, %v2584_v36  ;;  %v2586_v35 = vpop.permute.xlu1 %2585  ;;  %v3942_v26 = vpack.c.bf16 %v3170_v34, %v3169_v32 }
 0xfd5   : > { %3772 = vmatmul.mubr.msk.f32.vlgmr.msra.gmra.mrb[38].mxu0 %vm1487_vm8, %v4325_v9  ;;  %3793 = vmatprep.subr.mxu0 %v3995_v7  ;;  %v3480_v9 = vld [vmem:[%s4725_s4] ss:$0 sm:$0xff] }
 0xfd6   : > { %3795 = vmatprep.mubr.msk.f32.mxu0 %vm3994_vm1, %v3995_v7 }
 0xfd8   : > { %v2753_v52 = vpop.permute.xlu1 %2752 }
0x10a8   : > { %v2657_v47 = vpop.f32.mrb[38].mxu0 }
0x10a9   : > { %v2658_v12 = vadd.f32 %v2657_v47, %v2586_v35  ;;  %v3773_v38 = vpop.f32.mrb[39].mxu0  ;;  %v3945_v35 = vpack.c.bf16 %v3172_v33, %v3171_v37  ;;  %v3490_v47 = vld [vmem:[%s4726_s25] ss:$0 sm:$0xff] }
0x10ab   : > { %3791 = vmatmul.mubr.msk.f32.vlgmr.msra.gmra.mrb[26].mxu1 %vm1681_vm9, %v2658_v12 }
0x10ac   : > { %3810 = vmatprep.mubr.msk.f32.mxu1 %vm3994_vm1, %v3995_v7 }
0x117e   : > { %v2745_v39 = vpop.f32.mrb[26].mxu1 }
0x117f   : > { %v2746_v43 = vadd.f32 %v3480_v9, %v2745_v39  ;;  %v3792_v48 = vpop.f32.mrb[27].mxu1 }
0x1180   : > { %v3492_v48 = vld [vmem:[%s813_s28] ss:$0 sm:$0xff] }
0x1181   : > { %v2749_v49 = vmul.f32 %v2746_v43, %v4223_v17 }
0x1183   : > { %v2750_v50 = vadd.f32 %v2749_v49, %v4206_v15 }
0x1185   : > { %v4578_v40 = vadd.f32 %v2753_v52, %v2750_v50 }
0x1187   : > { %3794 = vmatpush3.msk.msra.mxu0 %vm1041_vm5, %v4578_v40 }
0x1188   : > { %3796 = vmatmul.mubr.msk.f32.vlgmr.msra.gmra.mrb[40].mxu0 %vm1037_vm6, %v4212_v16  ;;  %3798 = vmatprep.subr.mxu0 %v3995_v7 }
0x1189   : > { %3800 = vmatprep.mubr.msk.f32.mxu0 %vm3994_vm1, %v3995_v7 }
0x125b   : > { %v2825_v53 = vpop.f32.mrb[40].mxu0 }
0x125c   : > { %v3797_v54 = vpop.f32.mrb[41].mxu0  ;;  %v2829_v17 = vsel %vm1115_vm7, %v2825_v53, 0.0 }
0x125d   : > { %2830 = vadd.xlane.f32.xlu1 %v2829_v17 }
0x12ea   : > { %v2831_v15 = vpop.xlane.xlu1 %2830 }
0x12eb   : > { %v2832_v41 = vmul.f32 %v2831_v15, %v4229_v23 }
0x12ed   : > { %3799 = vmatpush3.msk.msra.mxu0 %vm931_vm3, %v2832_v41 }
0x12ee   : > { %3801 = vmatmul.mubr.msk.f32.vlgmr.msra.gmra.mrb[42].mxu0 %vm927_vm4, %v4189_v8  ;;  %3803 = vmatprep.subr.mxu0 %v3995_v7 }
0x12ef   : > { %3805 = vmatprep.mubr.msk.f32.mxu0 %vm3994_vm1, %v3995_v7 }
0x13c1   : > { %v2902_v56 = vpop.f32.mrb[42].mxu0 }
0x13c2   : > { %2908 = vperm.xlu0 %3963, %v2902_v56   ;;  %v3802_v57 = vpop.f32.mrb[43].mxu0 }
0x1441   : > { %v2909_v58 = vpop.permute.xlu0 %2908 }
0x1442   : > { %v4596_v59 = vsub.f32 %v4578_v40, %v2909_v58 }
0x1444   : > { %v2912_v61 = vmul.f32 %v4596_v59, %v4596_v59 }
0x1446   : > { %3804 = vmatpush3.msk.msra.mxu0 %vm1041_vm5, %v2912_v61 }
0x1447   : > { %3806 = vmatmul.mubr.msk.f32.vlgmr.msra.gmra.mrb[44].mxu0 %vm1037_vm6, %v4212_v16  ;;  %3917 = vmatprep.subr.bf16.mxu0 %v3993_v4  ;;  %v3984_v16 = vld [vmem:[%s4715_s2] sm:$0x7f] }
0x1448   : > { %3821 = vmatprep.mubr.msk.f32.mxu0 %vm3994_vm1, %v3995_v7 }
0x151a   : > { %v2982_v8 = vpop.f32.mrb[44].mxu0 }
0x151b   : > { %v3807_v62 = vpop.f32.mrb[45].mxu0  ;;  %v2986_v42 = vsel %vm1115_vm7, %v2982_v8, 0.0 }
0x151c   : > { %2987 = vadd.xlane.f32.xlu0 %v2986_v42 }
0x15a9   : > { %v2988_v63 = vpop.xlane.xlu0 %2987 }
0x15aa   : > { %v2989_v51 = vmul.f32 %v2988_v63, %v4229_v23  ;;  %v3918_v23 = vpack.c.bf16 %v3071_v55, %v3070_v0 }
0x15ac   : > { %3809 = vmatpush3.msk.msra.mxu1 %vm931_vm3, %v2989_v51  ;;  %3919 = vmatpush3.bf16.msra.mxu0 %v3918_v23 }
0x15ad   : > { %3811 = vmatmul.mubr.msk.f32.vlgmr.msra.gmra.mrb[28].mxu1 %vm927_vm4, %v3984_v16  ;;  %3923 = vmatprep.subr.bf16.mxu1 %v3993_v4 }
0x15ae   : > { %3856 = vmatprep.mubr.msk.f32.mxu1 %vm3994_vm1, %v3995_v7  ;;  %3920 = vmatprep.subr.bf16.mxu0 %v3993_v4 }
0x15af   : > { %3925 = vmatpush3.bf16.msra.mxu1 %v3924_v19 }
0x15b0   : > { %3922 = vmatpush3.bf16.msra.mxu0 %v3921_v6  ;;  %3926 = vmatprep.subr.bf16.mxu1 %v3993_v4 }
0x15b3   : > { %3928 = vmatpush3.bf16.msra.mxu1 %v3927_v21 }
0x15b4   : > { %3929 = vmatprep.subr.bf16.mxu1 %v3993_v4 }
0x15b7   : > { %3931 = vmatpush3.bf16.msra.mxu1 %v3930_v24 }
0x15b8   : > { %3932 = vmatprep.subr.bf16.mxu1 %v3993_v4 }
0x15bb   : > { %3934 = vmatpush3.bf16.msra.mxu1 %v3933_v45 }
0x15bc   : > { %3935 = vmatprep.subr.bf16.mxu1 %v3993_v4 }
0x15bf   : > { %3937 = vmatpush3.bf16.msra.mxu1 %v3936_v28 }
0x15c0   : > { %3938 = vmatprep.subr.bf16.mxu1 %v3993_v4 }
0x15c3   : > { %3940 = vmatpush3.bf16.msra.mxu1 %v3939_v46 }
0x15c4   : > { %3941 = vmatprep.subr.bf16.mxu1 %v3993_v4 }
0x15c7   : > { %3943 = vmatpush3.bf16.msra.mxu1 %v3942_v26 }
0x15c8   : > { %3944 = vmatprep.subr.bf16.mxu1 %v3993_v4 }
0x15cb   : > { %3946 = vmatpush3.bf16.msra.mxu1 %v3945_v35 }
0x1680   : > { %v3059_v60 = vpop.f32.mrb[28].mxu1 }
0x1681   : > { %v3060_v10 = vadd.f32 1e-05, %v3059_v60  ;;  %v3812_v11 = vpop.f32.mrb[29].mxu1 }
0x1683   : > { %3982 = vrsqrt.f32 %v3060_v10 }
0x168d   : > { %v3983_v7 = vpop.eup %3982 }
0x168e   : > { %3066 = vperm.xlu1 %3962, %v3983_v7  }
0x170d   : > { %v3067_v36 = vpop.permute.xlu1 %3066 }
0x170e   : > { %v3069_v31 = vmul.f32 %v3067_v36, %v4596_v59 }
0x1710   : > { %3822 = vmatmul.mubr.msk.f32.vlgmr.msra.gmra.mrb[46].mxu0 %vm853_vm2, %v3069_v31 }
0x17e3   : > { %v3150_v12 = vpop.f32.mrb[46].mxu0 }
0x17e4   : > { %v3151_v38 = vadd.f32 %v3490_v47, %v3150_v12  ;;  %v3823_v9 = vpop.f32.mrb[47].mxu0 }
0x17e6   : > { %vm3154_vm15 = vcmp.ge.f32.partialorder %v3151_v38, 0.0  ;;  %v3155_v4 = vmul.f32 0.01, %v3151_v38 }
0x17e8   : > { %v3156_v39 = vsel %vm3154_vm15, %v3151_v38, %v3155_v4 }
0x17e9   : > { %3857 = vmatmul.mubr.f32.vlgmr.msra.gmra.mrb[30].mxu1 %v3156_v39 }
0x18bc   : > { %v3239_v43 = vpop.f32.mrb[30].mxu1 }
0x18bd   : > { %v3243_v49 = vadd.f32 %v3239_v43, %v4578_v40  ;;  %v3858_v50 = vpop.f32.mrb[31].mxu1 }
0x18bf   : > { %v3251_v52 = vadd.f32 %v3492_v48, %v3243_v49 }
0x18c1   : > { %3252 = vst.msk [vmem:[%s4684_s20] sm:$0x7f] %vm2120_vm10, %v3251_v52 }
0x18c2 PF: > { %s4727_s12 = sld [smem:[#allocation2_spill]] }
0x18c8   : > { %s30_s1 = sadd.s32 1, %s4727_s12  }
0x18c9   : > { %p27_p5 = scmp.ge.s32.totalorder %s30_s1, 4  }
0x18cb   :  { %29 = sbr.rel (!%p27_p5) target bundleno = 14 (0xe), region = 166 }

// kernel: gfn_forward.14
= control target key start
LH: loop header
LB: loop body
LE: loop exit
PB: predicated region body
PF: predicated region fallthrough
CT: control target
= control target key end

     0   :  { %s218_s0 = inlined_call_operand.vmem [shape: f32[1,32], index: 0, kind: input, shape index: {}]   ;;  %s219_s1 = inlined_call_operand.vmem [shape: f32[32,1], index: 1, kind: input, shape index: {}]   ;;  %s220_s2 = inlined_call_operand.<no memory space> [shape: f32[1,1], index: 2, kind: input, shape index: {}]   ;;  %s221_s3 = inlined_call_operand.hbm [shape: f32[1,1], index: 3, kind: output, shape index: {}]  }
   0x1   :  { %v8_v0 = vstv %s220_s2 }
   0x2   :  { %9 = vst [vmem:[#allocation2] sm:$0x1] %v8_v0 }
   0x3   :  { %v18_v1 = vld [vmem:[%s219_s1] sm:$0xff]  ;;  %v19_v2 = vld [vmem:[%s219_s1 + $0x8] sm:$0xff]  ;;  %v20_v3 = vld [vmem:[%s219_s1 + $0x10] sm:$0xff]  ;;  %v164_v4 = vmov 0.0|0.0   ;;  %vm165_vm0 = vmmov 0   ;;  %v166_v7 = vmov 0.0  }
   0x4   :  { %130 = vmatprep.subr.bf16.mxu0 %v164_v4  ;;  %v131_v5 = vpack.c.bf16 %v19_v2, %v18_v1  ;;  %v21_v6 = vld [vmem:[%s219_s1 + $0x18] sm:$0xff]  ;;  %127 = vmatprep.mubr.msk.f32.mxu0 %vm165_vm0, %v166_v7 }
   0x5   :  { %10 = vsyncpa [#allocation4], 0  ;;  %v134_v8 = vpack.c.bf16 %v21_v6, %v20_v3  ;;  %v17_v9 = vld [vmem:[%s218_s0] sm:$0x1]  ;;  %vm23_vm1 = vcmask 261120   ;;  %s167_s23 = smov [#allocation3]  }
   0x6   :  { %132 = vmatpush3.bf16.msra.mxu0 %v131_v5  ;;  %s105_s24 = sshll.u32 %s167_s23, 4  ;;  %vm97_vm2 = vcmask 0   ;;  %s106_s24 = int_to_ptr.vmem [resolvable:$true] %s105_s24 }
   0x7   :  { %133 = vmatprep.subr.bf16.mxu0 %v164_v4  ;;  %s140_s1 = scalar_lea.vmem %s106_s24, 16  ;;  %s144_s25 = scalar_lea.vmem %s106_s24, 32 }
   0x8   :  { %p141_p0 = scmp.ne.s32.totalorder %s106_s24, %s140_s1  ;;  %p145_p1 = scmp.lt.s32.totalorder %s106_s24, %s106_s24 }
   0x9   :  { %v22_v10 = vld [vmem:[#allocation2] sm:$0x1]  ;;  %p146_p2 = scmp.lt.s32.totalorder %s144_s25, %s140_s1 }
   0xa   :  { %135 = vmatpush3.bf16.msra.mxu0 %v134_v8 }
   0xb   :  { %p147_p3 = por %p146_p2, %p145_p1 }
   0xd   :  { %128 = vmatmul.mubr.msk.f32.vlgmr.msra.gmra.mrb[0].mxu0 %vm23_vm1, %v17_v9  ;;  %p148_p4 = pnand %p147_p3, %p141_p0 }
  0xe0   :  { %v93_v11 = vpop.f32.mrb[0].mxu0 }
  0xe1   :  { %v94_v12 = vadd.f32 %v93_v11, %v22_v10  ;;  %v129_v13 = vpop.f32.mrb[1].mxu0 }
  0xe3   :  { %98 = vst.msk [vmem:[#allocation3] sm:$0x1] %vm97_vm2, %v94_v12 }
  0xe4   :  { %151 = shalt.err (!%p148_p4)
}
  0xe5   :  { %s152_s27 = scalar_lea.hbm %s221_s3, 16 }
  0xe6   :  { %p153_p5 = scmp.ne.s32.totalorder %s221_s3, %s152_s27  ;;  %p156_p6 = scmp.lt.u32.totalorder %s152_s27, %s221_s3 }
  0xe8   :  { %p158_p7 = pnand %p156_p6, %p153_p5 }
  0xea   :  { %161 = shalt.err (!%p158_p7)
}
  0xeb   :  { %108 = dma.vmem_to_hbm [thread:$0]  %s106_s24, 16, %s221_s3, [#allocation4]  }
  0xec   :  { %162 = dma.done.wait [#allocation4], 16  }
  0xed   :  { %163 = vsyncadd [#allocation4], 4294967280 }
  0xee   :  { %112 = vsyncpa [#allocation4], 1 }

</bundles_post_ra>
